<compile_context>
chip_gen: v7x
topology: tpu7x:2x2x1
jax: 0.10.0
libtpu: 0.0.40
codegen_flags: <defaults>
</compile_context>

<pallas_src>
import jax
import jax.numpy as jnp
from jax.experimental import pallas as pl
from jax.experimental.pallas import tpu as pltpu

LANE = 128
_MIB = 1024 * 1024


# --------------------------------------------------------------------------- #
# Kernels
# --------------------------------------------------------------------------- #
def _layer1_kernel(a_ref, x_ref, w1_ref, b1_ref, w2_ref, p_ref, acc_ref):
    """acc += Â[i,k] @ X[k]; on last k: P[i] = ReLU(acc @ W1 + b1) @ W2."""
    k = pl.program_id(1)

    @pl.when(k == 0)
    def _():
        acc_ref[...] = jnp.zeros_like(acc_ref)

    acc_ref[...] += jnp.dot(a_ref[...], x_ref[...],
                            preferred_element_type=jnp.float32)

    @pl.when(k == pl.num_programs(1) - 1)
    def _():
        # Epilogue (once per row tile): bias + ReLU + both feature projections,
        # kept in f32 for accuracy at negligible cost.
        h = jnp.dot(acc_ref[...], w1_ref[...],
                    preferred_element_type=jnp.float32) + b1_ref[...]
        h = jnp.maximum(h, 0.0)
        # Dropout: inference mode (training=False) -> identity.
        p_ref[...] = jnp.dot(h, w2_ref[...],
                             preferred_element_type=jnp.float32).astype(p_ref.dtype)


def _layer2_kernel(a_ref, p_ref, b2_ref, o_ref, acc_ref):
    """acc += Â[i,k] @ P[k]; on last k: O[i] = acc + b2."""
    k = pl.program_id(1)

    @pl.when(k == 0)
    def _():
        acc_ref[...] = jnp.zeros_like(acc_ref)

    acc_ref[...] += jnp.dot(a_ref[...], p_ref[...],
                            preferred_element_type=jnp.float32)

    @pl.when(k == pl.num_programs(1) - 1)
    def _():
        o_ref[...] = (acc_ref[...] + b2_ref[...]).astype(o_ref.dtype)


# --------------------------------------------------------------------------- #
# Tiling / padding helpers
# --------------------------------------------------------------------------- #
def _round_up(v, m):
    return ((v + m - 1) // m) * m


def _pad2(a, rows, cols):
    return jnp.pad(a, ((0, rows - a.shape[0]), (0, cols - a.shape[1])))


def choose_tiles(n, tm=512, tk=1024):
    """Pick (tm, tk, n_pad): tm/tk lane-aligned and clamped to the padded node
    axis, tk a multiple of tm that divides n_pad (no lcm padding blowup), and
    >=2 row tiles whenever the graph allows (v7x megacore: the 'parallel' row
    axis is what shards work across the 2 TensorCores)."""
    n128 = _round_up(n, LANE)
    tm = min(_round_up(max(tm, LANE), LANE), n128)
    if n128 // tm < 2 and n128 > LANE:
        tm = max(LANE, (n128 // 2 // LANE) * LANE)
    n_pad = _round_up(n128, tm)
    # tk: largest multiple of tm, <= requested tk, that divides n_pad exactly.
    nt = n_pad // tm
    j = max(1, min(max(tk, LANE) // tm, nt))
    while nt % j:
        j -= 1
    tk = j * tm
    return tm, tk, n_pad


def _vmem_budget(tm, tk, f_pad, h_pad, o_pad, a_buffers=3):
    """Scoped-VMEM limit matched to the tile sizes (mandatory on v5e whose
    default scoped limit is 16 MiB).  Capped at 64 MiB so a v6e-sized config
    cannot overrun v7x's 64 MiB physical VMEM."""
    a_bytes = a_buffers * tm * tk * 2                     # bf16 Â stream
    rhs_bytes = 2 * tk * max(f_pad, o_pad) * 2            # bf16 X / P k-tiles
    acc_bytes = tm * max(f_pad, o_pad) * 4                # f32 accumulator
    out_bytes = 2 * tm * o_pad * 4                        # output double buffer
    w_bytes = 2 * (f_pad * h_pad + h_pad * o_pad + h_pad + o_pad) * 4
    total = a_bytes + rhs_bytes + acc_bytes + out_bytes + w_bytes + 4 * _MIB
    return int(min(max(total, 32 * _MIB), 64 * _MIB))


# --------------------------------------------------------------------------- #
# Forward pass
# --------------------------------------------------------------------------- #
def gcn_forward(a_norm, x, w1, b1, w2, b2, *, tm=512, tk=1024):
    """a_norm: either the raw [N, N] f32 normalized adjacency, or (preferred)
    the pre-padded [n_pad, n_pad] bf16 matrix from build_norm_adj(..., n_pad=..)
    which avoids an extra full-matrix pad+cast HBM rewrite per forward."""
    n, f_in = x.shape
    hidden = w1.shape[1]
    out_dim = w2.shape[1]

    tm, tk, n_pad = choose_tiles(n, tm, tk)

    f_pad = _round_up(f_in, LANE)
    h_pad = _round_up(hidden, LANE)
    o_pad = _round_up(out_dim, LANE)

    if a_norm.shape == (n_pad, n_pad) and a_norm.dtype == jnp.bfloat16:
        a_p = a_norm                                       # already kernel-ready
    else:
        a_p = _pad2(a_norm, n_pad, n_pad).astype(jnp.bfloat16)

    x_p = _pad2(x, n_pad, f_pad).astype(jnp.bfloat16)      # MXU input
    # Epilogue operands stay f32 (used once per row tile, outside the k loop).
    w1_p = _pad2(w1, f_pad, h_pad).astype(jnp.float32)
    w2_p = _pad2(w2, h_pad, o_pad).astype(jnp.float32)
    b1_p = _pad2(b1.reshape(1, -1), 1, h_pad).astype(jnp.float32)
    b2_p = _pad2(b2.reshape(1, -1), 1, o_pad).astype(jnp.float32)

    grid = (n_pad // tm, n_pad // tk)
    a_buffers = max(2, min(3, grid[0] * grid[1]))          # 3-deep Â pipeline

    cparams = pltpu.CompilerParams(
        dimension_semantics=("parallel", "arbitrary"),
        vmem_limit_bytes=_vmem_budget(tm, tk, f_pad, h_pad, o_pad, a_buffers),
    )

    a_spec = pl.BlockSpec((tm, tk), lambda i, k: (i, k),
                          pipeline_mode=pl.Buffered(a_buffers))

    # Layer 1 (fused with H @ W2): P = ReLU((Â X) W1 + b1) W2 -> [n_pad, o_pad] bf16
    p = pl.pallas_call(
        _layer1_kernel,
        out_shape=jax.ShapeDtypeStruct((n_pad, o_pad), jnp.bfloat16),
        grid_spec=pltpu.PrefetchScalarGridSpec(
            num_scalar_prefetch=0,
            grid=grid,
            in_specs=[
                a_spec,                                               # Â tile
                pl.BlockSpec((tk, f_pad), lambda i, k: (k, 0)),       # X k-tile
                pl.BlockSpec((f_pad, h_pad), lambda i, k: (0, 0)),    # W1 (resident)
                pl.BlockSpec((1, h_pad), lambda i, k: (0, 0)),        # b1 (resident)
                pl.BlockSpec((h_pad, o_pad), lambda i, k: (0, 0)),    # W2 (resident)
            ],
            out_specs=pl.BlockSpec((tm, o_pad), lambda i, k: (i, 0)),
            scratch_shapes=[pltpu.VMEM((tm, f_pad), jnp.float32)],
        ),
        compiler_params=cparams,
    )(a_p, x_p, w1_p, b1_p, w2_p)

    # Layer 2: O = Â P + b2 -> [n_pad, o_pad] f32
    out = pl.pallas_call(
        _layer2_kernel,
        out_shape=jax.ShapeDtypeStruct((n_pad, o_pad), jnp.float32),
        grid_spec=pltpu.PrefetchScalarGridSpec(
            num_scalar_prefetch=0,
            grid=grid,
            in_specs=[
                a_spec,                                               # Â tile
                pl.BlockSpec((tk, o_pad), lambda i, k: (k, 0)),       # P k-tile
                pl.BlockSpec((1, o_pad), lambda i, k: (0, 0)),        # b2 (resident)
            ],
            out_specs=pl.BlockSpec((tm, o_pad), lambda i, k: (i, 0)),
            scratch_shapes=[pltpu.VMEM((tm, o_pad), jnp.float32)],
        ),
        compiler_params=cparams,
    )(a_p, p, b2_p)

    return out[:n, :out_dim]


# --------------------------------------------------------------------------- #
# Plain-JAX glue: data prep + init
# --------------------------------------------------------------------------- #
def build_norm_adj(edge_index, num_nodes, n_pad=None, dtype=jnp.float32):
    """Dense Â = D^-1/2 (A + I) D^-1/2 from a [2, E] edge_index.  Built directly
    at padded size / target dtype so the forward pass never re-pads or re-casts
    the full N² matrix.  (Note: duplicate edges / pre-existing self-loops are
    double-counted, unlike PyG's coalesced gcn_norm — data-prep convention.)"""
    if n_pad is None:
        n_pad = num_nodes
    src, dst = edge_index[0], edge_index[1]
    loops = jnp.arange(num_nodes, dtype=edge_index.dtype)
    src = jnp.concatenate([src, loops])
    dst = jnp.concatenate([dst, loops])
    a = jnp.zeros((n_pad, n_pad), jnp.float32).at[dst, src].add(1.0)
    deg = a.sum(axis=1)
    dinv = jnp.where(deg > 0, 1.0 / jnp.sqrt(deg), 0.0)
    return (dinv[:, None] * a * dinv[None, :]).astype(dtype)


def init_params(key, input_dim, hidden_dim, output_dim):
    k1, k2 = jax.random.split(key)

    # Glorot-uniform weights, zero bias (GCNConv default-style init), deterministic.
    def glorot(k, fan_in, fan_out):
        lim = jnp.sqrt(6.0 / (fan_in + fan_out))
        return jax.random.uniform(k, (fan_in, fan_out), jnp.float32, -lim, lim)

    w1 = glorot(k1, input_dim, hidden_dim)
    b1 = jnp.zeros((1, hidden_dim), jnp.float32)
    w2 = glorot(k2, hidden_dim, output_dim)
    b2 = jnp.zeros((1, output_dim), jnp.float32)
    return w1, b1, w2, b2


if __name__ == "__main__":
    key = jax.random.PRNGKey(0)
    kx, kp = jax.random.split(key)

    num_nodes = 512
    input_dim, hidden_dim, output_dim = 16, 32, 8
    tm_req, tk_req = 512, 1024

    # Node features [N, F_in]
    x = jax.random.normal(kx, (num_nodes, input_dim), jnp.float32)

    # Deterministic ring graph (bidirectional edges), edge_index shape [2, 2N]
    idx = jnp.arange(num_nodes, dtype=jnp.int32)
    nxt = (idx + 1) % num_nodes
    edge_index = jnp.stack(
        [jnp.concatenate([idx, nxt]), jnp.concatenate([nxt, idx])], axis=0
    )

    # Kernel-ready Â: built once, directly padded + bf16 (no per-forward rewrite).
    _, _, n_pad = choose_tiles(num_nodes, tm_req, tk_req)
    a_kernel = build_norm_adj(edge_index, num_nodes, n_pad=n_pad, dtype=jnp.bfloat16)

    w1, b1, w2, b2 = init_params(kp, input_dim, hidden_dim, output_dim)

    out = gcn_forward(a_kernel, x, w1, b1, w2, b2, tm=tm_req, tk=tk_req)
    jax.block_until_ready(out)

    # Reference in plain f32 JAX (kernel uses bf16 Â/X on the MXU -> loose tol).
    a_ref = build_norm_adj(edge_index, num_nodes)                 # f32, unpadded
    h_ref = jnp.maximum(a_ref @ (x @ w1) + b1, 0.0)
    o_ref = a_ref @ (h_ref @ w2) + b2
    assert out.shape == (num_nodes, output_dim)
    assert jnp.allclose(out, o_ref, atol=5e-2, rtol=5e-2), float(
        jnp.max(jnp.abs(out - o_ref))
    )

    print("KERNEL_OK")
</pallas_src>

<mosaic_0001>
module attributes {stable_mosaic.version = 11 : i64} {
  func.func @_layer1_kernel(%arg0: i32, %arg1: i32, %arg2: memref<256x512xbf16, #tpu.memory_space<vmem>>, %arg3: memref<512x128xbf16, #tpu.memory_space<vmem>>, %arg4: memref<128x128xf32, #tpu.memory_space<vmem>>, %arg5: memref<1x128xf32, #tpu.memory_space<vmem>>, %arg6: memref<128x128xf32, #tpu.memory_space<vmem>>, %arg7: memref<256x128xbf16, #tpu.memory_space<vmem>>, %arg8: memref<256x128xf32, #tpu.memory_space<vmem>>) attributes {dimension_semantics = [#tpu.dimension_semantics<parallel>, #tpu.dimension_semantics<arbitrary>], iteration_bounds = array<i64: 2, 1>, scalar_prefetch = 0 : i64, scratch_operands = 1 : i64, tpu.core_type = #tpu.core_type<tc>, window_params = [{pipeline_mode = #tpu.pipeline_mode<double_buffered>, transform_indices = @transform_0, window_bounds = array<i64: 256, 512>}, {transform_indices = @transform_1, window_bounds = array<i64: 512, 128>}, {pipeline_mode = #tpu.pipeline_mode<synchronous>, transform_indices = @transform_2, window_bounds = array<i64: 128, 128>}, {pipeline_mode = #tpu.pipeline_mode<synchronous>, transform_indices = @transform_3, window_bounds = array<i64: 1, 128>}, {pipeline_mode = #tpu.pipeline_mode<synchronous>, transform_indices = @transform_4, window_bounds = array<i64: 128, 128>}, {transform_indices = @transform_5, window_bounds = array<i64: 256, 128>}]} {
    %c0_i32 = arith.constant 0 : i32
    %0 = arith.cmpi eq, %arg1, %c0_i32 : i32
    %1 = arith.extui %0 : i1 to i32
    %c0_i32_0 = arith.constant 0 : i32
    %2 = arith.cmpi ne, %1, %c0_i32_0 : i32
    scf.if %2 {
      %cst_10 = arith.constant 0.000000e+00 : f32
      %12 = vector.broadcast %cst_10 : f32 to vector<256x128xf32>
      %c0_11 = arith.constant 0 : index
      %c0_12 = arith.constant 0 : index
      %13 = vector.load %arg8[%c0_11, %c0_12] : memref<256x128xf32, #tpu.memory_space<vmem>>, vector<256x128xf32>
      tpu.vector_store %arg8[%c0_11, %c0_12], %12 {strides = array<i32>} : memref<256x128xf32, #tpu.memory_space<vmem>>, vector<256x128xf32>,
    } else {
    }
    %c0 = arith.constant 0 : index
    %c0_1 = arith.constant 0 : index
    %3 = vector.load %arg8[%c0, %c0_1] : memref<256x128xf32, #tpu.memory_space<vmem>>, vector<256x128xf32>
    %c0_2 = arith.constant 0 : index
    %c0_3 = arith.constant 0 : index
    %4 = vector.load %arg2[%c0_2, %c0_3] : memref<256x512xbf16, #tpu.memory_space<vmem>>, vector<256x512xbf16>
    %c0_4 = arith.constant 0 : index
    %c0_5 = arith.constant 0 : index
    %5 = vector.load %arg3[%c0_4, %c0_5] : memref<512x128xbf16, #tpu.memory_space<vmem>>, vector<512x128xbf16>
    %cst = arith.constant dense<0.000000e+00> : vector<256x128xf32>
    %6 = tpu.matmul %4, %5, %cst {dimension_numbers = #tpu.dot_dimension_numbers<[1], [0], [0], [1], [0, 0, 1, 1], [], []>} : vector<256x512xbf16>, vector<512x128xbf16>, vector<256x128xf32> -> vector<256x128xf32>
    %7 = arith.addf %3, %6 : vector<256x128xf32>
    %c0_6 = arith.constant 0 : index
    %c0_7 = arith.constant 0 : index
    %8 = vector.load %arg8[%c0_6, %c0_7] : memref<256x128xf32, #tpu.memory_space<vmem>>, vector<256x128xf32>
    tpu.vector_store %arg8[%c0_6, %c0_7], %7 {strides = array<i32>} : memref<256x128xf32, #tpu.memory_space<vmem>>, vector<256x128xf32>,
    %c0_i32_8 = arith.constant 0 : i32
    %9 = arith.cmpi eq, %arg1, %c0_i32_8 : i32
    %10 = arith.extui %9 : i1 to i32
    %c0_i32_9 = arith.constant 0 : i32
    %11 = arith.cmpi ne, %10, %c0_i32_9 : i32
    scf.if %11 {
      %c0_10 = arith.constant 0 : index
      %c0_11 = arith.constant 0 : index
      %12 = vector.load %arg8[%c0_10, %c0_11] : memref<256x128xf32, #tpu.memory_space<vmem>>, vector<256x128xf32>
      %c0_12 = arith.constant 0 : index
      %c0_13 = arith.constant 0 : index
      %13 = vector.load %arg4[%c0_12, %c0_13] : memref<128x128xf32, #tpu.memory_space<vmem>>, vector<128x128xf32>
      %cst_14 = arith.constant dense<0.000000e+00> : vector<256x128xf32>
      %14 = tpu.matmul %12, %13, %cst_14 {dimension_numbers = #tpu.dot_dimension_numbers<[1], [0], [0], [1], [0, 0, 1, 1], [], []>} : vector<256x128xf32>, vector<128x128xf32>, vector<256x128xf32> -> vector<256x128xf32>
      %c0_15 = arith.constant 0 : index
      %c0_16 = arith.constant 0 : index
      %15 = vector.load %arg5[%c0_15, %c0_16] : memref<1x128xf32, #tpu.memory_space<vmem>>, vector<1x128xf32>
      %16 = vector.broadcast %15 : vector<1x128xf32> to vector<256x128xf32>
      %17 = arith.addf %14, %16 : vector<256x128xf32>
      %cst_17 = arith.constant 0.000000e+00 : f32
      %18 = vector.broadcast %cst_17 : f32 to vector<256x128xf32>
      %19 = arith.maximumf %17, %18 : vector<256x128xf32>
      %c0_18 = arith.constant 0 : index
      %c0_19 = arith.constant 0 : index
      %20 = vector.load %arg6[%c0_18, %c0_19] : memref<128x128xf32, #tpu.memory_space<vmem>>, vector<128x128xf32>
      %cst_20 = arith.constant dense<0.000000e+00> : vector<256x128xf32>
      %21 = tpu.matmul %19, %20, %cst_20 {dimension_numbers = #tpu.dot_dimension_numbers<[1], [0], [0], [1], [0, 0, 1, 1], [], []>} : vector<256x128xf32>, vector<128x128xf32>, vector<256x128xf32> -> vector<256x128xf32>
      %22 = arith.truncf %21 : vector<256x128xf32> to vector<256x128xbf16>
      %c0_21 = arith.constant 0 : index
      %c0_22 = arith.constant 0 : index
      %23 = vector.load %arg7[%c0_21, %c0_22] : memref<256x128xbf16, #tpu.memory_space<vmem>>, vector<256x128xbf16>
      tpu.vector_store %arg7[%c0_21, %c0_22], %22 {strides = array<i32>} : memref<256x128xbf16, #tpu.memory_space<vmem>>, vector<256x128xbf16>,
    } else {
    }
    return
  }
  func.func @transform_0(%arg0: i32, %arg1: i32) -> (i32, i32) {
    %c0_i32 = arith.constant 0 : i32
    return %arg0, %arg1 : i32, i32
  }
  func.func @transform_1(%arg0: i32, %arg1: i32) -> (i32, i32) {
    %c0_i32 = arith.constant 0 : i32
    %c0_i32_0 = arith.constant 0 : i32
    return %arg1, %c0_i32 : i32, i32
  }
  func.func @transform_2(%arg0: i32, %arg1: i32) -> (i32, i32) {
    %c0_i32 = arith.constant 0 : i32
    %c0_i32_0 = arith.constant 0 : i32
    %c0_i32_1 = arith.constant 0 : i32
    return %c0_i32, %c0_i32_0 : i32, i32
  }
  func.func @transform_3(%arg0: i32, %arg1: i32) -> (i32, i32) {
    %c0_i32 = arith.constant 0 : i32
    %c0_i32_0 = arith.constant 0 : i32
    %c0_i32_1 = arith.constant 0 : i32
    return %c0_i32, %c0_i32_0 : i32, i32
  }
  func.func @transform_4(%arg0: i32, %arg1: i32) -> (i32, i32) {
    %c0_i32 = arith.constant 0 : i32
    %c0_i32_0 = arith.constant 0 : i32
    %c0_i32_1 = arith.constant 0 : i32
    return %c0_i32, %c0_i32_0 : i32, i32
  }
  func.func @transform_5(%arg0: i32, %arg1: i32) -> (i32, i32) {
    %c0_i32 = arith.constant 0 : i32
    %c0_i32_0 = arith.constant 0 : i32
    return %arg0, %c0_i32 : i32, i32
  }
}

</mosaic_0001>

<bundles_post_ra>
// kernel: tpu_custom_call.1
= control target key start
LH: loop header
LB: loop body
LE: loop exit
PB: predicated region body
PF: predicated region fallthrough
CT: control target
= control target key end

     0   :  { %s3963_s0 = inlined_call_operand.hbm [shape: bf16[512,512], index: 0, kind: input, shape index: {}]   ;;  %s3964_s1 = inlined_call_operand.hbm [shape: bf16[512,128], index: 1, kind: input, shape index: {}]   ;;  %s3965_s2 = inlined_call_operand.hbm [shape: f32[128,128], index: 2, kind: input, shape index: {}]   ;;  %s3966_s3 = inlined_call_operand.vmem [shape: f32[1,128], index: 3, kind: input, shape index: {}]   ;;  %s3967_s4 = inlined_call_operand.hbm [shape: f32[128,128], index: 4, kind: input, shape index: {}]   ;;  %s3968_s5 = inlined_call_operand.hbm [shape: bf16[512,128], index: 5, kind: output, shape index: {}]  }
   0x1   :  { %3974 = sst [smem:[#allocation17_spill]] %s3964_s1 }
   0x2   :  { %10 = vsyncpa [#allocation4], 0 }
   0x3   :  { %12 = vsyncpa [#allocation4 + $0x1], 0 }
   0x4   :  { %13 = vsyncpa [#allocation7], 0 }
   0x5   :  { %14 = vsyncpa [#allocation10], 0 }
   0x6   :  { %15 = vsyncpa [#allocation5], 0 }
   0x7   :  { %17 = vsyncpa [#allocation5 + $0x1], 0  ;;  %s3559_s18 = smov 0   ;;  %s3561_s19 = smov 0  }
   0x8   :  { %s3563_s20 = smov 0   ;;  %s3565_s21 = smov 0  }
   0x9   :  { %s3567_s22 = smov 0   ;;  %s3569_s23 = smov 0  }
   0xa LB: > { %s2256_s24 = sadd.s32 4294967295, %s3514_s23   ;;  %s2257_s25 = sadd.s32 4294967294, %s3514_s23   ;;  %s3514_s23 = sphi %s3569_s23, %s23_s23   ;;  %s3510_s22 = sphi %s3567_s22, %s3998_s22   ;;  %s3506_s21 = sphi %s3565_s21, %s3997_s21   ;;  %s3502_s20 = sphi %s3563_s20, %s3996_s20   ;;  %s3498_s19 = sphi %s3561_s19, %s3995_s19   ;;  %s3494_s18 = sphi %s3559_s18, %s3994_s18  }
   0xb   : > { %p57_p0 = scmp.ne.s32.totalorder %s3498_s19, %s3494_s18  ;;  %p3593_p1 = scmp.eq.s32.totalorder %s2256_s24, 0 }
   0xc   : > { %p3597_p2 = scmp.eq.s32.totalorder %s2256_s24, 1  ;;  %p176_p3 = scmp.eq.s32.totalorder %s2257_s25, 1 }
   0xd   : > { %s3975_s26 = scalar_select %p3593_p1, 1, 0 }
   0xe   : > { %s3976_s27 = scalar_select %p3597_p2, 1, 0 }
   0xf   : > { %p3603_p4 = por %p3593_p1, %p57_p0  ;;  %p2258_p5 = scmp.ge.s32.totalorder %s3514_s23, 1 }
  0x10   : > { %p3608_p6 = por %p176_p3, %p57_p0  ;;  %p183_p7 = scmp.lt.s32.totalorder %s3514_s23, 3 }
  0x11   : > { %s3977_s28 = scalar_select %p3603_p4, 1, 0 }
  0x12   : > { %s3978_s29 = scalar_select %p3608_p6, 1, 0 }
  0x13   : > { %p3613_p8 = pnand %p2258_p5, %p183_p7  ;;  %s3516_s6 = smov [#allocation6]  }
  0x14   : > { %3979 = sst [smem:[#allocation16_spill]] %s3978_s29  ;;  %s198_s7 = sshll.u32 %s3516_s6, 4  ;;  %s3617_s7 = int_to_ptr.vmem [resolvable:$true] %s198_s7 }
  0x15   : > { %s3980_s30 = scalar_select %p3613_p8, 1, 0 }
  0x16   : > { %p3097_p9 = pneg %p3613_p8  ;;  %s3517_s9 = smov [#allocation8]  }
  0x17   : > { %s211_s10 = sshll.u32 %s3517_s9, 4  ;;  %s3982_s1 = sld [smem:[#allocation17_spill]]  ;;  %s3628_s10 = int_to_ptr.vmem [resolvable:$true] %s211_s10 }
  0x18   : > { %p3624_p11 = pnand %p3097_p9, %p3593_p1 }
  0x1a   : > { %p3638_p13 = pneg %p3624_p11 }
  0x1d   : > { %s3310_s13 = scalar_lea.hbm %s3982_s1, 4096 }
  0x1e   : > { %p3311_p12 = scmp.ne.s32.totalorder %s3982_s1, %s3310_s13  ;;  %p3317_p5 = scmp.lt.u32.totalorder %s3310_s13, %s3982_s1 }
  0x20   : > { %p3313_p0 = pnand %p3638_p13, %p3311_p12 }
  0x22   : > { %p3314_p3 = pneg %p3313_p0 }
  0x24   : > { %p3319_p7 = pnand %p3317_p5, %p3314_p3 }
  0x26   : > { %3322 = shalt.err (!%p3319_p7)
}
  0x27   : > { %s3323_s25 = scalar_lea.vmem %s3617_s7, 4096  ;;  %p3331_p1 = scmp.lt.s32.totalorder %s3617_s7, %s3617_s7 }
  0x28   : > { %p3324_p9 = scmp.ne.s32.totalorder %s3617_s7, %s3323_s25  ;;  %p3332_p4 = scmp.lt.s32.totalorder %s3323_s25, %s3323_s25 }
  0x2a   : > { %p3326_p10 = pnand %p3324_p9, %p3638_p13  ;;  %p3333_p12 = por %p3332_p4, %p3331_p1 }
  0x2c   : > { %p3327_p6 = pneg %p3326_p10 }
  0x2e   : > { %p3334_p0 = pnand %p3333_p12, %p3327_p6 }
  0x30   : > { %3337 = shalt.err (!%p3334_p0)
}
  0x31   : > { %s3518_s6 = smov 64   ;;  %s3519_s9 = smov 4  }
  0x32   : > { %3100 = dma.hbm_to_vmem [thread:$0]  (!%p3624_p11), %s3982_s1, 4096, %s3617_s7, [#allocation7], %s3518_s6, %s3518_s6, %s3519_s9  }
  0x33   : > { %s3338_s15 = scalar_lea.hbm %s3965_s2, 2048 }
  0x34   : > { %p3339_p1 = scmp.ne.s32.totalorder %s3965_s2, %s3338_s15  ;;  %p3345_p10 = scmp.lt.u32.totalorder %s3338_s15, %s3965_s2 }
  0x36   : > { %p3341_p4 = pnand %p3339_p1, %p3638_p13 }
  0x38   : > { %p3342_p6 = pneg %p3341_p4 }
  0x3a   : > { %p3347_p3 = pnand %p3345_p10, %p3342_p6 }
  0x3c   : > { %3350 = shalt.err (!%p3347_p3)
}
  0x3d   : > { %s3351_s7 = scalar_lea.vmem %s3628_s10, 2048  ;;  %p3359_p12 = scmp.lt.s32.totalorder %s3628_s10, %s3628_s10 }
  0x3e   : > { %p3352_p5 = scmp.ne.s32.totalorder %s3628_s10, %s3351_s7  ;;  %p3360_p0 = scmp.lt.s32.totalorder %s3351_s7, %s3351_s7 }
  0x40   : > { %p3354_p7 = pnand %p3352_p5, %p3638_p13  ;;  %p3361_p1 = por %p3360_p0, %p3359_p12 }
  0x42   : > { %p3355_p9 = pneg %p3354_p7 }
  0x44   : > { %p3362_p4 = pnand %p3361_p1, %p3355_p9 }
  0x46   : > { %3365 = shalt.err (!%p3362_p4)
}
  0x47   : > { %s3520_s6 = smov 128   ;;  %s3521_s29 = smov 8  }
  0x48   : > { %3103 = dma.hbm_to_vmem [thread:$0]  (!%p3624_p11), %s3965_s2, 2048, %s3628_s10, [#allocation7], %s3520_s6, %s3520_s6, %s3521_s29  }
  0x49   : > { %s3522_s12 = smov [#allocation9]   ;;  %s3366_s17 = scalar_lea.hbm %s3967_s4, 2048 }
  0x4a   : > { %s227_s13 = sshll.u32 %s3522_s12, 4  ;;  %p3367_p6 = scmp.ne.s32.totalorder %s3967_s4, %s3366_s17  ;;  %s228_s13 = int_to_ptr.vmem [resolvable:$true] %s227_s13 }
  0x4b   : > { %p3373_p5 = scmp.lt.u32.totalorder %s3366_s17, %s3967_s4 }
  0x4c   : > { %p3369_p10 = pnand %p3367_p6, %p3638_p13 }
  0x4e   : > { %p3370_p3 = pneg %p3369_p10 }
  0x50   : > { %p3375_p7 = pnand %p3373_p5, %p3370_p3 }
  0x52   : > { %3378 = shalt.err (!%p3375_p7)
}
  0x53   : > { %s3379_s10 = scalar_lea.vmem %s228_s13, 2048  ;;  %p3387_p1 = scmp.lt.s32.totalorder %s228_s13, %s228_s13 }
  0x54   : > { %p3380_p9 = scmp.ne.s32.totalorder %s228_s13, %s3379_s10  ;;  %p3388_p4 = scmp.lt.s32.totalorder %s3379_s10, %s3379_s10 }
  0x56   : > { %p3382_p12 = pnand %p3380_p9, %p3638_p13  ;;  %p3389_p8 = por %p3388_p4, %p3387_p1 }
  0x58   : > { %p3383_p0 = pneg %p3382_p12 }
  0x5a   : > { %p3390_p2 = pnand %p3389_p8, %p3383_p0 }
  0x5c   : > { %3393 = shalt.err (!%p3390_p2)
}
  0x5d   : > { %3106 = dma.hbm_to_vmem [thread:$0]  (!%p3624_p11), %s3967_s4, 2048, %s228_s13, [#allocation10], %s3520_s6, %s3520_s6, %s3521_s29  }
  0x5e   : > { %s35_s1 = sadd.s32 1, %s3510_s22  ;;  %s44_s16 = sadd.s32 1, %s3502_s20 }
  0x5f   : > { %p37_p8 = scmp.ge.s32.totalorder %s35_s1, 2  ;;  %p51_p2 = scmp.ne.s32.totalorder %s3502_s20, %s3498_s19 }
  0x60   : > { %p52_p13 = scmp.eq.s32.totalorder %s3514_s23, 0  ;;  %p3985_p10 = scmp.ne.s32.totalorder %s3976_s27, 0 }
  0x61   : > { %s4000_s1 = smov (%p37_p8, %s35_s1), 0  ;;  %p3118_p11 = scmp.lt.s32.totalorder %s3514_s23, 2 }
  0x62   : > { %p3707_p6 = por %p52_p13, %p51_p2  ;;  %p3713_p3 = por %p3985_p10, %p51_p2 }
  0x63   : > { %s39_s14 = ssub.s32 %s3510_s22, %s4000_s1  ;;  %s241_s6 = sand.u32 1, %s3502_s20  }
  0x64   : > { %p42_p5 = scmp.eq.s32.totalorder %s39_s14, 0  ;;  %s2263_s29 = sshll.u32 %s241_s6, 9 }
  0x65   : > { %s2408_s15 = sshll.u32 %s3510_s22, 13  ;;  %s245_s27 = scalar_lea.vmem [#allocation3], %s2263_s29 }
  0x66   : > { %s3722_s13 = scalar_select %p42_p5, %s3502_s20, %s44_s16  }
  0x67   : > { %s3728_s25 = scalar_lea.hbm %s3963_s0, %s2408_s15  ;;  %s255_s7 = sshll.u32 %s245_s27, 4  ;;  %s3730_s7 = int_to_ptr.vmem [resolvable:$true] %s255_s7 }
  0x68   : > { %p3734_p7 = pnand %p3118_p11, %p3707_p6  ;;  %s3738_s9 = scalar_lea.sflag [#allocation4], %s241_s6 }
  0x69   : > { %s3394_s11 = scalar_lea.hbm %s3728_s25, 8192  ;;  %s3399_s8 = scalar_lea.hbm %s3963_s0, 16384 }
  0x6a   : > { %p3395_p9 = scmp.ne.s32.totalorder %s3728_s25, %s3394_s11  ;;  %p3396_p12 = pneg %p3734_p7 }
  0x6b   : > { %p3400_p4 = scmp.lt.u32.totalorder %s3728_s25, %s3963_s0  ;;  %p3401_p8 = scmp.lt.u32.totalorder %s3399_s8, %s3394_s11 }
  0x6c   : > { %p3397_p0 = pnand %p3396_p12, %p3395_p9  ;;  %p3403_p13 = scmp.lt.u32.totalorder %s3394_s11, %s3728_s25 }
  0x6d   : > { %p3402_p2 = por %p3401_p8, %p3400_p4 }
  0x6e   : > { %p3398_p1 = pneg %p3397_p0 }
  0x6f   : > { %p3404_p6 = por %p3403_p13, %p3402_p2 }
  0x71   : > { %p3405_p10 = pnand %p3404_p6, %p3398_p1 }
  0x73   : > { %3408 = shalt.err (!%p3405_p10)
}
  0x74   : > { %s3409_s6 = scalar_lea.vmem %s3730_s7, 8192  ;;  %s3523_s17 = smov [#allocation3]  }
  0x75   : > { %p3410_p11 = scmp.ne.s32.totalorder %s3730_s7, %s3409_s6  ;;  %s3414_s24 = sshll.u32 %s3523_s17, 4  ;;  %s3415_s24 = int_to_ptr.vmem [resolvable:$false] %s3414_s24 }
  0x76   : > { %s3416_s27 = scalar_lea.vmem %s3415_s24, 16384  ;;  %p3417_p0 = scmp.lt.s32.totalorder %s3730_s7, %s3415_s24 }
  0x77   : > { %p3412_p5 = pnand %p3410_p11, %p3396_p12  ;;  %p3418_p4 = scmp.lt.s32.totalorder %s3416_s27, %s3409_s6 }
  0x79   : > { %p3413_p9 = pneg %p3412_p5  ;;  %p3419_p8 = por %p3418_p4, %p3417_p0 }
  0x7b   : > { %p3420_p2 = pnand %p3419_p8, %p3413_p9 }
  0x7d   : > { %3423 = shalt.err (!%p3420_p2)
}
  0x7e   : > { %s3524_s11 = smov 256   ;;  %s3525_s16 = smov 16  }
  0x7f   : > { %3110 = dma.hbm_to_vmem [thread:$0]  (!%p3734_p7), %s3728_s25, 8192, %s3730_s7, %s3738_s9, %s3524_s11, %s3524_s11, %s3525_s16  }
  0x80   : > { %p3988_p12 = scmp.ne.s32.totalorder %s3980_s30, 0 }
  0x81   : > { %s3769_s14 = sand.u32 (!%p3988_p12), 1, %s3498_s19   ;;  %p3989_p1 = scmp.ne.s32.totalorder (!%p3988_p12), %s3977_s28, 0 }
  0x82   : > { %267 = sbr.rel (%p3988_p12) target bundleno = 965 (0x3c5), region = 40  ;;  %s2268_s8 = sshll.u32 (!%p3988_p12), %s3769_s14, 9 }
  0x83   : > { %s270_s29 = scalar_lea.sflag (!%p3988_p12), [#allocation4], %s3769_s14  ;;  %s3773_s15 = scalar_lea.vmem (!%p3988_p12), [#allocation3], %s2268_s8 }
  0x89   : > { %3477 = dma.done.wait (%p3989_p1), %s270_s29, 8192  }
  0x8a   : > { %3479 = vsyncadd (%p3989_p1), %s270_s29, 4294959104  ;;  %p3990_p7 = scmp.ne.s32.totalorder %s3975_s26, 0 }
  0x8c   : > { %3481 = dma.done.wait (%p3990_p7), [#allocation7], 6144  }
  0x8d   : > { %3483 = vsyncadd (%p3990_p7), [#allocation7], 4294961152 }
  0x8e   : > { %3485 = dma.done.wait (%p3990_p7), [#allocation10], 2048  }
  0x8f   : > { %3487 = vsyncadd (%p3990_p7), [#allocation10], 4294965248  ;;  %v3182_v0 = vld [vmem:[#allocation6 + $0x40] sm:$0xff]   ;;  %v3186_v4 = vld [vmem:[#allocation6 + $0x48] sm:$0xff]   ;;  %s2272_s30 = sshll.u32 %s3769_s14, 7  ;;  %s2441_s7 = sshll.u32 %s3506_s21, 11 }
  0x90   : > { %v3183_v1 = vld [vmem:[#allocation6 + $0xc0] sm:$0xff]   ;;  %2537 = vmatprep.subr.bf16.mxu0 %v3182_v0  ;;  %v3187_v5 = vld [vmem:[#allocation6 + $0xc8] sm:$0xff]   ;;  %v3190_v8 = vld [vmem:[#allocation6 + $0x50] sm:$0xff]   ;;  %s3889_s25 = scalar_lea.vmem [#allocation11], %s2272_s30  ;;  %s3911_s17 = scalar_lea.hbm %s3968_s5, %s2441_s7 }
  0x91   : > { %v3184_v2 = vld [vmem:[#allocation6] sm:$0xff]   ;;  %2649 = vmatprep.subr.bf16.mxu1 %v3183_v1  ;;  %v3188_v6 = vld [vmem:[#allocation6 + $0x8] sm:$0xff]   ;;  %v3191_v9 = vld [vmem:[#allocation6 + $0xd0] sm:$0xff]   ;;  %s2141_s10 = sshll.u32 %s3889_s25, 4  ;;  %s2128_s24 = scalar_lea.sflag [#allocation5], %s3769_s14  ;;  %s3913_s10 = int_to_ptr.vmem [resolvable:$true] %s2141_s10 }
  0x92   : > { %v3185_v3 = vld [vmem:[#allocation6 + $0x80] sm:$0xff]   ;;  %2538 = vmatpush3.bf16.msra.mxu0 %v3184_v2  ;;  %v3189_v7 = vld [vmem:[#allocation6 + $0x88] sm:$0xff]   ;;  %v3192_v10 = vld [vmem:[#allocation6 + $0x10] sm:$0xff]   ;;  %s3424_s27 = scalar_lea.vmem %s3913_s10, 2048  ;;  %s3526_s21 = smov [#allocation11]  }
  0x93   : > { %2650 = vmatpush3.bf16.msra.mxu1 %v3185_v3  ;;  %2539 = vmatprep.subr.bf16.mxu0 %v3186_v4  ;;  %v3193_v11 = vld [vmem:[#allocation6 + $0x90] sm:$0xff]   ;;  %v3194_v12 = vld [vmem:[#allocation6 + $0x58] sm:$0xff]   ;;  %v3198_v16 = vld [vmem:[#allocation6 + $0x60] sm:$0xff]   ;;  %p3425_p13 = scmp.ne.s32.totalorder %s3913_s10, %s3424_s27  ;;  %s3428_s11 = sshll.u32 %s3526_s21, 4  ;;  %s3429_s11 = int_to_ptr.vmem [resolvable:$false] %s3428_s11 }
  0x94   : > { %2651 = vmatprep.subr.bf16.mxu1 %v3187_v5  ;;  %v3195_v13 = vld [vmem:[#allocation6 + $0xd8] sm:$0xff]   ;;  %v3199_v17 = vld [vmem:[#allocation6 + $0xe0] sm:$0xff]   ;;  %v3202_v20 = vld [vmem:[#allocation6 + $0x68] sm:$0xff]   ;;  %s3430_s16 = scalar_lea.vmem %s3429_s11, 4096  ;;  %p3431_p11 = scmp.lt.s32.totalorder %s3913_s10, %s3429_s11 }
  0x95   : > { %v3196_v14 = vld [vmem:[#allocation6 + $0x18] sm:$0xff]   ;;  %v3200_v18 = vld [vmem:[#allocation6 + $0x20] sm:$0xff]   ;;  %v3203_v21 = vld [vmem:[#allocation6 + $0xe8] sm:$0xff]   ;;  %p3426_p6 = pnand %p3425_p13, %p3713_p3  ;;  %p3432_p5 = scmp.lt.s32.totalorder %s3430_s16, %s3424_s27 }
  0x96   : > { %2540 = vmatpush3.bf16.msra.mxu0 %v3188_v6  ;;  %v3197_v15 = vld [vmem:[#allocation6 + $0x98] sm:$0xff]   ;;  %v3201_v19 = vld [vmem:[#allocation6 + $0xa0] sm:$0xff]   ;;  %v3204_v22 = vld [vmem:[#allocation6 + $0x28] sm:$0xff]  }
  0x97   : > { %2652 = vmatpush3.bf16.msra.mxu1 %v3189_v7  ;;  %2541 = vmatprep.subr.bf16.mxu0 %v3190_v8  ;;  %v3205_v23 = vld [vmem:[#allocation6 + $0xa8] sm:$0xff]   ;;  %v3206_v24 = vld [vmem:[#allocation6 + $0x70] sm:$0xff]   ;;  %v3210_v28 = vld [vmem:[#allocation6 + $0x78] sm:$0xff]   ;;  %p3427_p10 = pneg %p3426_p6  ;;  %p3433_p9 = por %p3432_p5, %p3431_p11 }
  0x98   : > { %2653 = vmatprep.subr.bf16.mxu1 %v3191_v9  ;;  %v3207_v25 = vld [vmem:[#allocation6 + $0xf0] sm:$0xff]   ;;  %v3211_v29 = vld [vmem:[#allocation6 + $0xf8] sm:$0xff]   ;;  %v1446_v58 = vld [vmem:[#allocation8] sm:$0xff] }
  0x99   : > { %v3208_v26 = vld [vmem:[#allocation6 + $0x30] sm:$0xff]   ;;  %v3212_v30 = vld [vmem:[#allocation6 + $0x38] sm:$0xff]   ;;  %v1447_v59 = vld [vmem:[#allocation8 + $0x8] sm:$0xff]  ;;  %p3434_p0 = pnand %p3433_p9, %p3427_p10 }
  0x9a   : > { %2542 = vmatpush3.bf16.msra.mxu0 %v3192_v10  ;;  %v3209_v27 = vld [vmem:[#allocation6 + $0xb0] sm:$0xff]   ;;  %v3213_v31 = vld [vmem:[#allocation6 + $0xb8] sm:$0xff]   ;;  %v3017_v62 = vpack.c.bf16 %v1447_v59, %v1446_v58  ;;  %v1450_v0 = vld [vmem:[#allocation8 + $0x20] sm:$0xff] }
  0x9b   : > { %2654 = vmatpush3.bf16.msra.mxu1 %v3193_v11  ;;  %2543 = vmatprep.subr.bf16.mxu0 %v3194_v12  ;;  %v3214_v32 = vld [vmem:[%s3773_s15] ss:$16 sps:$4 sm:$0xff]   ;;  %v3216_v33 = vld [vmem:[%s3773_s15 + $0x4] ss:$16 sps:$4 sm:$0xff]   ;;  %v3217_v34 = vld [vmem:[%s3773_s15 + $0x8] ss:$16 sps:$4 sm:$0xff]  }
  0x9c   : > { %2655 = vmatprep.subr.bf16.mxu1 %v3195_v13  ;;  %v3219_v35 = vld [vmem:[%s3773_s15 + $0xc] ss:$16 sps:$4 sm:$0xff]   ;;  %1057 = vmatprep.mubr.bf16.mxu0 %v3216_v33  ;;  %v3220_v36 = vld [vmem:[%s3773_s15 + $0x24] ss:$16 sps:$4 sm:$0xff]   ;;  %v3224_v38 = vld [vmem:[%s3773_s15 + $0x20] ss:$16 sps:$4 sm:$0xff]  }
  0x9d   : > { %1218 = vmatprep.mubr.bf16.mxu1 %v3219_v35  ;;  %v3222_v37 = vld [vmem:[%s3773_s15 + $0x2c] ss:$16 sps:$4 sm:$0xff]   ;;  %v3225_v39 = vld [vmem:[%s3773_s15 + $0x28] ss:$16 sps:$4 sm:$0xff]   ;;  %v3226_v40 = vld [vmem:[%s3773_s15 + $0x44] ss:$16 sps:$4 sm:$0xff]  }
  0x9e   : > { %2544 = vmatpush3.bf16.msra.mxu0 %v3196_v14  ;;  %v3228_v41 = vld [vmem:[%s3773_s15 + $0x4c] ss:$16 sps:$4 sm:$0xff]   ;;  %v3230_v42 = vld [vmem:[%s3773_s15 + $0x40] ss:$16 sps:$4 sm:$0xff]   ;;  %v3231_v43 = vld [vmem:[%s3773_s15 + $0x48] ss:$16 sps:$4 sm:$0xff]  }
  0x9f   : > { %2656 = vmatpush3.bf16.msra.mxu1 %v3197_v15  ;;  %2545 = vmatprep.subr.bf16.mxu0 %v3198_v16  ;;  %v3232_v44 = vld [vmem:[%s3773_s15 + $0x64] ss:$16 sps:$4 sm:$0xff]   ;;  %v3234_v45 = vld [vmem:[%s3773_s15 + $0x6c] ss:$16 sps:$4 sm:$0xff]   ;;  %v3236_v46 = vld [vmem:[%s3773_s15 + $0x60] ss:$16 sps:$4 sm:$0xff]  }
  0xa0   : > { %2657 = vmatprep.subr.bf16.mxu1 %v3199_v17  ;;  %v3237_v47 = vld [vmem:[%s3773_s15 + $0x68] ss:$16 sps:$4 sm:$0xff]   ;;  %v3238_v48 = vld [vmem:[%s3773_s15 + $0x84] ss:$16 sps:$4 sm:$0xff]   ;;  %v3240_v49 = vld [vmem:[%s3773_s15 + $0x8c] ss:$16 sps:$4 sm:$0xff]  }
  0xa1   : > { %v3242_v50 = vld [vmem:[%s3773_s15 + $0x80] ss:$16 sps:$4 sm:$0xff]   ;;  %v3243_v51 = vld [vmem:[%s3773_s15 + $0x88] ss:$16 sps:$4 sm:$0xff]   ;;  %v3244_v52 = vld [vmem:[%s3773_s15 + $0xa4] ss:$16 sps:$4 sm:$0xff]  }
  0xa2   : > { %2546 = vmatpush3.bf16.msra.mxu0 %v3200_v18  ;;  %v3246_v53 = vld [vmem:[%s3773_s15 + $0xac] ss:$16 sps:$4 sm:$0xff]   ;;  %v3248_v54 = vld [vmem:[%s3773_s15 + $0xa0] ss:$16 sps:$4 sm:$0xff]   ;;  %v3249_v55 = vld [vmem:[%s3773_s15 + $0xa8] ss:$16 sps:$4 sm:$0xff]  }
  0xa3   : > { %2658 = vmatpush3.bf16.msra.mxu1 %v3201_v19  ;;  %2547 = vmatprep.subr.bf16.mxu0 %v3202_v20  ;;  %v3250_v56 = vld [vmem:[%s3773_s15 + $0xc4] ss:$16 sps:$4 sm:$0xff]   ;;  %v3252_v57 = vld [vmem:[%s3773_s15 + $0xcc] ss:$16 sps:$4 sm:$0xff]   ;;  %v3254_v2 = vld [vmem:[%s3773_s15 + $0xc0] ss:$16 sps:$4 sm:$0xff]  }
  0xa4   : > { %2659 = vmatprep.subr.bf16.mxu1 %v3203_v21  ;;  %v1448_v60 = vld [vmem:[#allocation8 + $0x10] sm:$0xff]  ;;  %v1449_v61 = vld [vmem:[#allocation8 + $0x18] sm:$0xff]  ;;  %v1451_v1 = vld [vmem:[#allocation8 + $0x28] sm:$0xff] }
  0xa5   : > { %v3021_v63 = vpack.c.bf16 %v1449_v61, %v1448_v60  ;;  %v3255_v3 = vld [vmem:[%s3773_s15 + $0xc8] ss:$16 sps:$4 sm:$0xff]   ;;  %v3025_v4 = vpack.c.bf16 %v1451_v1, %v1450_v0  ;;  %v3256_v5 = vld [vmem:[%s3773_s15 + $0xe4] ss:$16 sps:$4 sm:$0xff]   ;;  %v3258_v8 = vld [vmem:[%s3773_s15 + $0xec] ss:$16 sps:$4 sm:$0xff]  }
  0xa6   : > { %2548 = vmatpush3.bf16.msra.mxu0 %v3204_v22  ;;  %v1452_v6 = vld [vmem:[#allocation8 + $0x30] sm:$0xff]  ;;  %v1453_v7 = vld [vmem:[#allocation8 + $0x38] sm:$0xff]  ;;  %v1454_v10 = vld [vmem:[#allocation8 + $0x40] sm:$0xff] }
  0xa7   : > { %2660 = vmatpush3.bf16.msra.mxu1 %v3205_v23  ;;  %2549 = vmatprep.subr.bf16.mxu0 %v3206_v24  ;;  %v3029_v9 = vpack.c.bf16 %v1453_v7, %v1452_v6  ;;  %v1455_v11 = vld [vmem:[#allocation8 + $0x48] sm:$0xff]  ;;  %v3260_v12 = vld [vmem:[%s3773_s15 + $0xe0] ss:$16 sps:$4 sm:$0xff]   ;;  %v3262_v15 = vld [vmem:[%s3773_s15 + $0x104] ss:$16 sps:$4 sm:$0xff]  }
  0xa8   : > { %2661 = vmatprep.subr.bf16.mxu1 %v3207_v25  ;;  %v3261_v13 = vld [vmem:[%s3773_s15 + $0xe8] ss:$16 sps:$4 sm:$0xff]   ;;  %v3033_v14 = vpack.c.bf16 %v1455_v11, %v1454_v10  ;;  %v1456_v16 = vld [vmem:[#allocation8 + $0x50] sm:$0xff]  ;;  %v3264_v18 = vld [vmem:[%s3773_s15 + $0x10c] ss:$16 sps:$4 sm:$0xff]  }
  0xa9   : > { %v1457_v17 = vld [vmem:[#allocation8 + $0x58] sm:$0xff]  ;;  %v3266_v20 = vld [vmem:[%s3773_s15 + $0x100] ss:$16 sps:$4 sm:$0xff]   ;;  %v3268_v22 = vld [vmem:[%s3773_s15 + $0x124] ss:$16 sps:$4 sm:$0xff]  }
  0xaa   : > { %2550 = vmatpush3.bf16.msra.mxu0 %v3208_v26  ;;  %v3037_v19 = vpack.c.bf16 %v1457_v17, %v1456_v16  ;;  %v3267_v21 = vld [vmem:[%s3773_s15 + $0x108] ss:$16 sps:$4 sm:$0xff]   ;;  %v3270_v23 = vld [vmem:[%s3773_s15 + $0x12c] ss:$16 sps:$4 sm:$0xff]   ;;  %v3272_v24 = vld [vmem:[%s3773_s15 + $0x120] ss:$16 sps:$4 sm:$0xff]  }
  0xab   : > { %2662 = vmatpush3.bf16.msra.mxu1 %v3209_v27  ;;  %2551 = vmatprep.subr.bf16.mxu0 %v3210_v28  ;;  %v3273_v25 = vld [vmem:[%s3773_s15 + $0x128] ss:$16 sps:$4 sm:$0xff]   ;;  %v3274_v26 = vld [vmem:[%s3773_s15 + $0x144] ss:$16 sps:$4 sm:$0xff]   ;;  %v3276_v27 = vld [vmem:[%s3773_s15 + $0x14c] ss:$16 sps:$4 sm:$0xff]  }
  0xac   : > { %2663 = vmatprep.subr.bf16.mxu1 %v3211_v29  ;;  %v3278_v28 = vld [vmem:[%s3773_s15 + $0x140] ss:$16 sps:$4 sm:$0xff]   ;;  %v3279_v29 = vld [vmem:[%s3773_s15 + $0x148] ss:$16 sps:$4 sm:$0xff]  }
  0xad   : > { %v1459_v33 = vld [vmem:[#allocation8 + $0x68] sm:$0xff]  ;;  %v3284_v35 = vld [vmem:[%s3773_s15 + $0x160] ss:$16 sps:$4 sm:$0xff]   ;;  %v1733_v16 = vld [vmem:[#allocation9 + $0x38] sm:$0xff] }
  0xae   : > { %2552 = vmatpush3.bf16.msra.mxu0 %v3212_v30  ;;  %v3280_v30 = vld [vmem:[%s3773_s15 + $0x164] ss:$16 sps:$4 sm:$0xff]   ;;  %v1727_v60 = vld [vmem:[#allocation9 + $0x8] sm:$0xff] }
  0xaf   : > { %2664 = vmatpush3.bf16.msra.mxu1 %v3213_v31  ;;  %3018 = vmatprep.subr.bf16.mxu0 %v3017_v62  ;;  %v3282_v31 = vld [vmem:[%s3773_s15 + $0x16c] ss:$16 sps:$4 sm:$0xff]   ;;  %v1726_v59 = vld [vmem:[#allocation9] sm:$0xff]  ;;  %v1728_v61 = vld [vmem:[#allocation9 + $0x10] sm:$0xff] }
  0xb0   : > { %v3049_v1 = vpack.c.bf16 %v1727_v60, %v1726_v59  ;;  %v1730_v7 = vld [vmem:[#allocation9 + $0x20] sm:$0xff] }
  0xb1   : > { %1058 = vmatmul.mubr.bf16.vlgmr.msra.gmra.mrb[0].mxu0 %v3214_v32  ;;  %v1458_v32 = vld [vmem:[#allocation8 + $0x60] sm:$0xff] }
  0xb2   : > { %1219 = vmatmul.mubr.bf16.vlgmr.msra.gmra.mrb[0].mxu1 %v3217_v34  ;;  %1065 = vmatprep.mubr.bf16.mxu0 %v3220_v36  ;;  %v3041_v34 = vpack.c.bf16 %v1459_v33, %v1458_v32  ;;  %v3285_v36 = vld [vmem:[%s3773_s15 + $0x168] ss:$16 sps:$4 sm:$0xff]  }
  0xb3   : > { %1226 = vmatprep.mubr.bf16.mxu1 %v3222_v37  ;;  %3020 = vmatpush3.bf16.msra.mxu0 %v3017_v62  ;;  %v3286_v37 = vld [vmem:[%s3773_s15 + $0x184] ss:$16 sps:$4 sm:$0xff]  }
  0xb4   : > { %3022 = vmatprep.subr.bf16.mxu0 %v3021_v63  ;;  %3050 = vmatprep.subr.bf16.mxu1 %v3049_v1 }
  0xb5   : > { %3052 = vmatpush3.bf16.msra.mxu1 %v3049_v1 }
  0xb7   : > { %3024 = vmatpush3.bf16.msra.mxu0 %v3021_v63 }
  0xb8   : > { %3026 = vmatprep.subr.bf16.mxu0 %v3025_v4 }
  0xb9   : > { %1066 = vmatmul.mubr.bf16.gmra.mrb[4].mxu0 %v3224_v38  ;;  %v1460_v38 = vld [vmem:[#allocation8 + $0x70] sm:$0xff] }
  0xba   : > { %1227 = vmatmul.mubr.bf16.gmra.mrb[4].mxu1 %v3225_v39  ;;  %1073 = vmatprep.mubr.bf16.mxu0 %v3226_v40  ;;  %v1461_v39 = vld [vmem:[#allocation8 + $0x78] sm:$0xff] }
  0xbb   : > { %1234 = vmatprep.mubr.bf16.mxu1 %v3228_v41  ;;  %3028 = vmatpush3.bf16.msra.mxu0 %v3025_v4  ;;  %v3288_v40 = vld [vmem:[%s3773_s15 + $0x18c] ss:$16 sps:$4 sm:$0xff]   ;;  %v3045_v41 = vpack.c.bf16 %v1461_v39, %v1460_v38 }
  0xbc   : > { %3030 = vmatprep.subr.bf16.mxu0 %v3029_v9 }
  0xbf   : > { %3032 = vmatpush3.bf16.msra.mxu0 %v3029_v9 }
  0xc0   : > { %3034 = vmatprep.subr.bf16.mxu0 %v3033_v14 }
  0xc1   : > { %1074 = vmatmul.mubr.bf16.gmra.mrb[8].mxu0 %v3230_v42  ;;  %v3290_v42 = vld [vmem:[%s3773_s15 + $0x180] ss:$16 sps:$4 sm:$0xff]  }
  0xc2   : > { %1235 = vmatmul.mubr.bf16.gmra.mrb[8].mxu1 %v3231_v43  ;;  %1081 = vmatprep.mubr.bf16.mxu0 %v3232_v44  ;;  %v3291_v43 = vld [vmem:[%s3773_s15 + $0x188] ss:$16 sps:$4 sm:$0xff]   ;;  %v3292_v44 = vld [vmem:[%s3773_s15 + $0x1a4] ss:$16 sps:$4 sm:$0xff]  }
  0xc3   : > { %1242 = vmatprep.mubr.bf16.mxu1 %v3234_v45  ;;  %3036 = vmatpush3.bf16.msra.mxu0 %v3033_v14  ;;  %v3294_v45 = vld [vmem:[%s3773_s15 + $0x1ac] ss:$16 sps:$4 sm:$0xff]  }
  0xc4   : > { %3038 = vmatprep.subr.bf16.mxu0 %v3037_v19 }
  0xc7   : > { %3040 = vmatpush3.bf16.msra.mxu0 %v3037_v19 }
  0xc8   : > { %3042 = vmatprep.subr.bf16.mxu0 %v3041_v34 }
  0xc9   : > { %1082 = vmatmul.mubr.bf16.gmra.mrb[12].mxu0 %v3236_v46  ;;  %v3296_v46 = vld [vmem:[%s3773_s15 + $0x1a0] ss:$16 sps:$4 sm:$0xff]  }
  0xca   : > { %1243 = vmatmul.mubr.bf16.gmra.mrb[12].mxu1 %v3237_v47  ;;  %1089 = vmatprep.mubr.bf16.mxu0 %v3238_v48  ;;  %v3297_v47 = vld [vmem:[%s3773_s15 + $0x1a8] ss:$16 sps:$4 sm:$0xff]   ;;  %v3298_v48 = vld [vmem:[%s3773_s15 + $0x1c4] ss:$16 sps:$4 sm:$0xff]  }
  0xcb   : > { %1250 = vmatprep.mubr.bf16.mxu1 %v3240_v49  ;;  %3044 = vmatpush3.bf16.msra.mxu0 %v3041_v34  ;;  %v3300_v49 = vld [vmem:[%s3773_s15 + $0x1cc] ss:$16 sps:$4 sm:$0xff]  }
  0xcc   : > { %3046 = vmatprep.subr.bf16.mxu0 %v3045_v41 }
  0xcf   : > { %3048 = vmatpush3.bf16.msra.mxu0 %v3045_v41 }
  0xd1   : > { %1090 = vmatmul.mubr.bf16.gmra.mrb[16].mxu0 %v3242_v50  ;;  %v3302_v50 = vld [vmem:[%s3773_s15 + $0x1c0] ss:$16 sps:$4 sm:$0xff]  }
  0xd2   : > { %1251 = vmatmul.mubr.bf16.gmra.mrb[16].mxu1 %v3243_v51  ;;  %1097 = vmatprep.mubr.bf16.mxu0 %v3244_v52  ;;  %v3303_v51 = vld [vmem:[%s3773_s15 + $0x1c8] ss:$16 sps:$4 sm:$0xff]   ;;  %v3304_v52 = vld [vmem:[%s3773_s15 + $0x1e4] ss:$16 sps:$4 sm:$0xff]  }
  0xd3   : > { %1258 = vmatprep.mubr.bf16.mxu1 %v3246_v53  ;;  %v3306_v53 = vld [vmem:[%s3773_s15 + $0x1ec] ss:$16 sps:$4 sm:$0xff]  }
  0xd9   : > { %1098 = vmatmul.mubr.bf16.gmra.mrb[20].mxu0 %v3248_v54  ;;  %v3308_v54 = vld [vmem:[%s3773_s15 + $0x1e0] ss:$16 sps:$4 sm:$0xff]  }
  0xda   : > { %1259 = vmatmul.mubr.bf16.gmra.mrb[20].mxu1 %v3249_v55  ;;  %1105 = vmatprep.mubr.bf16.mxu0 %v3250_v56  ;;  %v3309_v55 = vld [vmem:[%s3773_s15 + $0x1e8] ss:$16 sps:$4 sm:$0xff]  }
  0xdb   : > { %1266 = vmatprep.mubr.bf16.mxu1 %v3252_v57 }
  0xe1   : > { %1106 = vmatmul.mubr.bf16.gmra.mrb[24].mxu0 %v3254_v2  ;;  %v1729_v2 = vld [vmem:[#allocation9 + $0x18] sm:$0xff] }
  0xe2   : > { %1267 = vmatmul.mubr.bf16.gmra.mrb[24].mxu1 %v3255_v3  ;;  %1113 = vmatprep.mubr.bf16.mxu0 %v3256_v5  ;;  %v3053_v6 = vpack.c.bf16 %v1729_v2, %v1728_v61 }
  0xe3   : > { %1274 = vmatprep.mubr.bf16.mxu1 %v3258_v8  ;;  %v1731_v8 = vld [vmem:[#allocation9 + $0x28] sm:$0xff] }
  0xe4   : > { %3054 = vmatprep.subr.bf16.mxu1 %v3053_v6 }
  0xe5   : > { %3056 = vmatpush3.bf16.msra.mxu1 %v3053_v6 }
  0xe9   : > { %1114 = vmatmul.mubr.bf16.gmra.mrb[28].mxu0 %v3260_v12 }
  0xea   : > { %1275 = vmatmul.mubr.bf16.gmra.mrb[28].mxu1 %v3261_v13  ;;  %1121 = vmatprep.mubr.bf16.mxu0 %v3262_v15  ;;  %v3057_v13 = vpack.c.bf16 %v1731_v8, %v1730_v7  ;;  %v1732_v15 = vld [vmem:[#allocation9 + $0x30] sm:$0xff] }
  0xeb   : > { %1282 = vmatprep.mubr.bf16.mxu1 %v3264_v18 }
  0xec   : > { %3058 = vmatprep.subr.bf16.mxu1 %v3057_v13 }
  0xed   : > { %3060 = vmatpush3.bf16.msra.mxu1 %v3057_v13 }
  0xf1   : > { %1122 = vmatmul.mubr.bf16.gmra.mrb[32].mxu0 %v3266_v20 }
  0xf2   : > { %1283 = vmatmul.mubr.bf16.gmra.mrb[32].mxu1 %v3267_v21  ;;  %1129 = vmatprep.mubr.bf16.mxu0 %v3268_v22 }
  0xf3   : > { %1290 = vmatprep.mubr.bf16.mxu1 %v3270_v23  ;;  %v3061_v23 = vpack.c.bf16 %v1733_v16, %v1732_v15 }
  0xf5   : > { %3062 = vmatprep.subr.bf16.mxu1 %v3061_v23 }
  0xf6   : > { %3064 = vmatpush3.bf16.msra.mxu1 %v3061_v23 }
  0xf9   : > { %1130 = vmatmul.mubr.bf16.gmra.mrb[36].mxu0 %v3272_v24 }
  0xfa   : > { %1291 = vmatmul.mubr.bf16.gmra.mrb[36].mxu1 %v3273_v25  ;;  %1137 = vmatprep.mubr.bf16.mxu0 %v3274_v26 }
  0xfb   : > { %1298 = vmatprep.mubr.bf16.mxu1 %v3276_v27  ;;  %v1734_v27 = vld [vmem:[#allocation9 + $0x40] sm:$0xff] }
 0x101   : > { %1138 = vmatmul.mubr.bf16.gmra.mrb[40].mxu0 %v3278_v28  ;;  %v1735_v28 = vld [vmem:[#allocation9 + $0x48] sm:$0xff] }
 0x102   : > { %1299 = vmatmul.mubr.bf16.gmra.mrb[40].mxu1 %v3279_v29  ;;  %1145 = vmatprep.mubr.bf16.mxu0 %v3280_v30  ;;  %v3065_v33 = vpack.c.bf16 %v1735_v28, %v1734_v27 }
 0x103   : > { %1306 = vmatprep.mubr.bf16.mxu1 %v3282_v31 }
 0x104   : > { %3066 = vmatprep.subr.bf16.mxu1 %v3065_v33 }
 0x105   : > { %3068 = vmatpush3.bf16.msra.mxu1 %v3065_v33 }
 0x109   : > { %1146 = vmatmul.mubr.bf16.gmra.mrb[44].mxu0 %v3284_v35  ;;  %v1736_v35 = vld [vmem:[#allocation9 + $0x50] sm:$0xff] }
 0x10a   : > { %1307 = vmatmul.mubr.bf16.gmra.mrb[44].mxu1 %v3285_v36  ;;  %1153 = vmatprep.mubr.bf16.mxu0 %v3286_v37  ;;  %v1737_v36 = vld [vmem:[#allocation9 + $0x58] sm:$0xff] }
 0x10b   : > { %1314 = vmatprep.mubr.bf16.mxu1 %v3288_v40 }
 0x111   : > { %1154 = vmatmul.mubr.bf16.gmra.mrb[48].mxu0 %v3290_v42 }
 0x112   : > { %1315 = vmatmul.mubr.bf16.gmra.mrb[48].mxu1 %v3291_v43  ;;  %1161 = vmatprep.mubr.bf16.mxu0 %v3292_v44  ;;  %v3069_v43 = vpack.c.bf16 %v1737_v36, %v1736_v35 }
 0x113   : > { %1322 = vmatprep.mubr.bf16.mxu1 %v3294_v45 }
 0x114   : > { %3070 = vmatprep.subr.bf16.mxu1 %v3069_v43 }
 0x115   : > { %3072 = vmatpush3.bf16.msra.mxu1 %v3069_v43 }
 0x119   : > { %1162 = vmatmul.mubr.bf16.gmra.mrb[52].mxu0 %v3296_v46 }
 0x11a   : > { %1323 = vmatmul.mubr.bf16.gmra.mrb[52].mxu1 %v3297_v47  ;;  %1169 = vmatprep.mubr.bf16.mxu0 %v3298_v48  ;;  %v1738_v47 = vld [vmem:[#allocation9 + $0x60] sm:$0xff]  ;;  %v1739_v48 = vld [vmem:[#allocation9 + $0x68] sm:$0xff] }
 0x11b   : > { %1330 = vmatprep.mubr.bf16.mxu1 %v3300_v49 }
 0x121   : > { %1170 = vmatmul.mubr.bf16.gmra.mrb[56].mxu0 %v3302_v50 }
 0x122   : > { %1331 = vmatmul.mubr.bf16.gmra.mrb[56].mxu1 %v3303_v51  ;;  %1177 = vmatprep.mubr.bf16.mxu0 %v3304_v52 }
 0x123   : > { %1338 = vmatprep.mubr.bf16.mxu1 %v3306_v53  ;;  %v3073_v53 = vpack.c.bf16 %v1739_v48, %v1738_v47 }
 0x125   : > { %3074 = vmatprep.subr.bf16.mxu1 %v3073_v53 }
 0x126   : > { %3076 = vmatpush3.bf16.msra.mxu1 %v3073_v53 }
 0x129   : > { %1178 = vmatmul.mubr.bf16.gmra.mrb[60].mxu0 %v3308_v54 }
 0x12a   : > { %1339 = vmatmul.mubr.bf16.gmra.mrb[60].mxu1 %v3309_v55 }
 0x184   : > { %v2553_v56 = vpop.f32.mrb[0].mxu0 }
 0x185   : > { %v2665_v57 = vpop.f32.mrb[0].mxu1  ;;  %v2554_v58 = vpop.f32.mrb[1].mxu0 }
 0x186   : > { %v2555_v62 = vadd.f32 %v2554_v58, %v2553_v56  ;;  %v2666_v63 = vpop.f32.mrb[1].mxu1  ;;  %v2556_v0 = vpop.f32.mrb[2].mxu0 }
 0x187   : > { %v2667_v3 = vadd.f32 %v2666_v63, %v2665_v57  ;;  %v2668_v4 = vpop.f32.mrb[2].mxu1  ;;  %v2557_v5 = vpop.f32.mrb[3].mxu0 }
 0x188   : > { %v2558_v9 = vadd.f32 %v2557_v5, %v2556_v0  ;;  %v2669_v10 = vpop.f32.mrb[3].mxu1 }
 0x189   : > { %v1221_v11 = vadd.f32 %v2667_v3, %v2555_v62  ;;  %v2670_v12 = vadd.f32 %v2669_v10, %v2668_v4 }
 0x18b   : > { %v1224_v14 = vadd.f32 %v2670_v12, %v2558_v9  ;;  %2889 = vmatprep.mubr.f32.mxu0 %v1221_v11 }
 0x18c   : > { %v2559_v17 = vpop.f32.mrb[4].mxu0 }
 0x18d   : > { %v2671_v18 = vpop.f32.mrb[4].mxu1  ;;  %2890 = vmatmul.mubr.f32.vlgmr.msra.gmra.mrb[64].mxu0 %v1224_v14  ;;  %v2560_v19 = vpop.f32.mrb[5].mxu0 }
 0x18e   : > { %v2561_v20 = vadd.f32 %v2560_v19, %v2559_v17  ;;  %v2672_v21 = vpop.f32.mrb[5].mxu1  ;;  %v2562_v22 = vpop.f32.mrb[6].mxu0 }
 0x18f   : > { %v2673_v24 = vadd.f32 %v2672_v21, %v2671_v18  ;;  %v2674_v25 = vpop.f32.mrb[6].mxu1  ;;  %v2563_v26 = vpop.f32.mrb[7].mxu0 }
 0x190   : > { %v2564_v29 = vadd.f32 %v2563_v26, %v2562_v22  ;;  %v2675_v30 = vpop.f32.mrb[7].mxu1 }
 0x191   : > { %v1229_v31 = vadd.f32 %v2673_v24, %v2561_v20  ;;  %v2676_v32 = vadd.f32 %v2675_v30, %v2674_v25 }
 0x193   : > { %v1232_v34 = vadd.f32 %v2676_v32, %v2564_v29  ;;  %2892 = vmatprep.mubr.f32.mxu0 %v1229_v31 }
 0x194   : > { %v2565_v37 = vpop.f32.mrb[8].mxu0 }
 0x195   : > { %v2677_v38 = vpop.f32.mrb[8].mxu1  ;;  %2893 = vmatmul.mubr.f32.gmra.mrb[66].mxu0 %v1232_v34  ;;  %v2566_v39 = vpop.f32.mrb[9].mxu0 }
 0x196   : > { %v2567_v40 = vadd.f32 %v2566_v39, %v2565_v37  ;;  %v2678_v41 = vpop.f32.mrb[9].mxu1  ;;  %v2568_v42 = vpop.f32.mrb[10].mxu0 }
 0x197   : > { %v2679_v44 = vadd.f32 %v2678_v41, %v2677_v38  ;;  %v2680_v45 = vpop.f32.mrb[10].mxu1  ;;  %v2569_v46 = vpop.f32.mrb[11].mxu0 }
 0x198   : > { %v2570_v49 = vadd.f32 %v2569_v46, %v2568_v42  ;;  %v2681_v50 = vpop.f32.mrb[11].mxu1 }
 0x199   : > { %v1237_v51 = vadd.f32 %v2679_v44, %v2567_v40  ;;  %v2682_v52 = vadd.f32 %v2681_v50, %v2680_v45 }
 0x19b   : > { %v1240_v54 = vadd.f32 %v2682_v52, %v2570_v49  ;;  %2895 = vmatprep.mubr.f32.mxu0 %v1237_v51 }
 0x19c   : > { %v2571_v55 = vpop.f32.mrb[12].mxu0 }
 0x19d   : > { %v2683_v56 = vpop.f32.mrb[12].mxu1  ;;  %2896 = vmatmul.mubr.f32.gmra.mrb[68].mxu0 %v1240_v54  ;;  %v2572_v57 = vpop.f32.mrb[13].mxu0 }
 0x19e   : > { %v2573_v58 = vadd.f32 %v2572_v57, %v2571_v55  ;;  %v2684_v59 = vpop.f32.mrb[13].mxu1  ;;  %v2574_v60 = vpop.f32.mrb[14].mxu0 }
 0x19f   : > { %v2685_v61 = vadd.f32 %v2684_v59, %v2683_v56  ;;  %v2686_v62 = vpop.f32.mrb[14].mxu1  ;;  %v2575_v63 = vpop.f32.mrb[15].mxu0 }
 0x1a0   : > { %v2576_v0 = vadd.f32 %v2575_v63, %v2574_v60  ;;  %v2687_v1 = vpop.f32.mrb[15].mxu1 }
 0x1a1   : > { %v1245_v2 = vadd.f32 %v2685_v61, %v2573_v58  ;;  %v2688_v3 = vadd.f32 %v2687_v1, %v2686_v62 }
 0x1a3   : > { %v1248_v4 = vadd.f32 %v2688_v3, %v2576_v0  ;;  %2898 = vmatprep.mubr.f32.mxu0 %v1245_v2 }
 0x1a4   : > { %v2577_v5 = vpop.f32.mrb[16].mxu0 }
 0x1a5   : > { %v2689_v6 = vpop.f32.mrb[16].mxu1  ;;  %2899 = vmatmul.mubr.f32.gmra.mrb[70].mxu0 %v1248_v4  ;;  %v2578_v7 = vpop.f32.mrb[17].mxu0 }
 0x1a6   : > { %v2579_v8 = vadd.f32 %v2578_v7, %v2577_v5  ;;  %v2690_v9 = vpop.f32.mrb[17].mxu1  ;;  %v2580_v10 = vpop.f32.mrb[18].mxu0 }
 0x1a7   : > { %v2691_v11 = vadd.f32 %v2690_v9, %v2689_v6  ;;  %v2692_v12 = vpop.f32.mrb[18].mxu1  ;;  %v2581_v13 = vpop.f32.mrb[19].mxu0 }
 0x1a8   : > { %v2582_v14 = vadd.f32 %v2581_v13, %v2580_v10  ;;  %v2693_v15 = vpop.f32.mrb[19].mxu1 }
 0x1a9   : > { %v1253_v16 = vadd.f32 %v2691_v11, %v2579_v8  ;;  %v2694_v17 = vadd.f32 %v2693_v15, %v2692_v12 }
 0x1ab   : > { %v1256_v18 = vadd.f32 %v2694_v17, %v2582_v14  ;;  %2901 = vmatprep.mubr.f32.mxu0 %v1253_v16 }
 0x1ac   : > { %v2583_v19 = vpop.f32.mrb[20].mxu0 }
 0x1ad   : > { %v2695_v20 = vpop.f32.mrb[20].mxu1  ;;  %2902 = vmatmul.mubr.f32.gmra.mrb[72].mxu0 %v1256_v18  ;;  %v2584_v21 = vpop.f32.mrb[21].mxu0 }
 0x1ae   : > { %v2585_v22 = vadd.f32 %v2584_v21, %v2583_v19  ;;  %v2696_v23 = vpop.f32.mrb[21].mxu1  ;;  %v2586_v24 = vpop.f32.mrb[22].mxu0 }
 0x1af   : > { %v2697_v25 = vadd.f32 %v2696_v23, %v2695_v20  ;;  %v2698_v26 = vpop.f32.mrb[22].mxu1  ;;  %v2587_v27 = vpop.f32.mrb[23].mxu0 }
 0x1b0   : > { %v2588_v28 = vadd.f32 %v2587_v27, %v2586_v24  ;;  %v2699_v29 = vpop.f32.mrb[23].mxu1 }
 0x1b1   : > { %v1261_v30 = vadd.f32 %v2697_v25, %v2585_v22  ;;  %v2700_v31 = vadd.f32 %v2699_v29, %v2698_v26 }
 0x1b3   : > { %v1264_v32 = vadd.f32 %v2700_v31, %v2588_v28  ;;  %2904 = vmatprep.mubr.f32.mxu0 %v1261_v30 }
 0x1b4   : > { %v2589_v33 = vpop.f32.mrb[24].mxu0 }
 0x1b5   : > { %v2701_v34 = vpop.f32.mrb[24].mxu1  ;;  %2905 = vmatmul.mubr.f32.gmra.mrb[74].mxu0 %v1264_v32  ;;  %v2590_v35 = vpop.f32.mrb[25].mxu0 }
 0x1b6   : > { %v2591_v36 = vadd.f32 %v2590_v35, %v2589_v33  ;;  %v2702_v37 = vpop.f32.mrb[25].mxu1  ;;  %v2592_v38 = vpop.f32.mrb[26].mxu0 }
 0x1b7   : > { %v2703_v39 = vadd.f32 %v2702_v37, %v2701_v34  ;;  %v2704_v40 = vpop.f32.mrb[26].mxu1  ;;  %v2593_v41 = vpop.f32.mrb[27].mxu0 }
 0x1b8   : > { %v2594_v42 = vadd.f32 %v2593_v41, %v2592_v38  ;;  %v2705_v43 = vpop.f32.mrb[27].mxu1 }
 0x1b9   : > { %v1269_v44 = vadd.f32 %v2703_v39, %v2591_v36  ;;  %v2706_v45 = vadd.f32 %v2705_v43, %v2704_v40 }
 0x1bb   : > { %v1272_v46 = vadd.f32 %v2706_v45, %v2594_v42  ;;  %2907 = vmatprep.mubr.f32.mxu0 %v1269_v44 }
 0x1bc   : > { %v2595_v47 = vpop.f32.mrb[28].mxu0 }
 0x1bd   : > { %v2707_v48 = vpop.f32.mrb[28].mxu1  ;;  %2908 = vmatmul.mubr.f32.gmra.mrb[76].mxu0 %v1272_v46  ;;  %v2596_v49 = vpop.f32.mrb[29].mxu0 }
 0x1be   : > { %v2597_v50 = vadd.f32 %v2596_v49, %v2595_v47  ;;  %v2708_v51 = vpop.f32.mrb[29].mxu1  ;;  %v2598_v52 = vpop.f32.mrb[30].mxu0 }
 0x1bf   : > { %v2709_v53 = vadd.f32 %v2708_v51, %v2707_v48  ;;  %v2710_v54 = vpop.f32.mrb[30].mxu1  ;;  %v2599_v55 = vpop.f32.mrb[31].mxu0  ;;  %v1741_v51 = vld [vmem:[#allocation9 + $0x78] sm:$0xff] }
 0x1c0   : > { %v2600_v56 = vadd.f32 %v2599_v55, %v2598_v52  ;;  %v2711_v57 = vpop.f32.mrb[31].mxu1 }
 0x1c1   : > { %v1277_v58 = vadd.f32 %v2709_v53, %v2597_v50  ;;  %v2712_v59 = vadd.f32 %v2711_v57, %v2710_v54  ;;  %v1740_v50 = vld [vmem:[#allocation9 + $0x70] sm:$0xff] }
 0x1c2   : > { %v3077_v54 = vpack.c.bf16 %v1741_v51, %v1740_v50 }
 0x1c3   : > { %v1280_v60 = vadd.f32 %v2712_v59, %v2600_v56  ;;  %2910 = vmatprep.mubr.f32.mxu0 %v1277_v58 }
 0x1c4   : > { %v2601_v61 = vpop.f32.mrb[32].mxu0  ;;  %3078 = vmatprep.subr.bf16.mxu1 %v3077_v54 }
 0x1c5   : > { %v2713_v62 = vpop.f32.mrb[32].mxu1  ;;  %2911 = vmatmul.mubr.f32.gmra.mrb[78].mxu0 %v1280_v60  ;;  %v2602_v63 = vpop.f32.mrb[33].mxu0  ;;  %3080 = vmatpush3.bf16.msra.mxu1 %v3077_v54 }
 0x1c6   : > { %v2603_v0 = vadd.f32 %v2602_v63, %v2601_v61  ;;  %v2714_v1 = vpop.f32.mrb[33].mxu1  ;;  %v2604_v2 = vpop.f32.mrb[34].mxu0 }
 0x1c7   : > { %v2715_v3 = vadd.f32 %v2714_v1, %v2713_v62  ;;  %v2716_v4 = vpop.f32.mrb[34].mxu1  ;;  %v2605_v5 = vpop.f32.mrb[35].mxu0 }
 0x1c8   : > { %v2606_v6 = vadd.f32 %v2605_v5, %v2604_v2  ;;  %v2717_v7 = vpop.f32.mrb[35].mxu1 }
 0x1c9   : > { %v1285_v8 = vadd.f32 %v2715_v3, %v2603_v0  ;;  %v2718_v9 = vadd.f32 %v2717_v7, %v2716_v4 }
 0x1cb   : > { %v1288_v10 = vadd.f32 %v2718_v9, %v2606_v6  ;;  %2913 = vmatprep.mubr.f32.mxu0 %v1285_v8 }
 0x1cc   : > { %v2607_v11 = vpop.f32.mrb[36].mxu0 }
 0x1cd   : > { %v2719_v12 = vpop.f32.mrb[36].mxu1  ;;  %2914 = vmatmul.mubr.f32.gmra.mrb[80].mxu0 %v1288_v10  ;;  %v2608_v13 = vpop.f32.mrb[37].mxu0 }
 0x1ce   : > { %v2609_v14 = vadd.f32 %v2608_v13, %v2607_v11  ;;  %v2720_v15 = vpop.f32.mrb[37].mxu1  ;;  %v2610_v16 = vpop.f32.mrb[38].mxu0 }
 0x1cf   : > { %v2721_v17 = vadd.f32 %v2720_v15, %v2719_v12  ;;  %v2722_v18 = vpop.f32.mrb[38].mxu1  ;;  %v2611_v19 = vpop.f32.mrb[39].mxu0 }
 0x1d0   : > { %v2612_v20 = vadd.f32 %v2611_v19, %v2610_v16  ;;  %v2723_v21 = vpop.f32.mrb[39].mxu1 }
 0x1d1   : > { %v1293_v22 = vadd.f32 %v2721_v17, %v2609_v14  ;;  %v2724_v23 = vadd.f32 %v2723_v21, %v2722_v18 }
 0x1d3   : > { %v1296_v24 = vadd.f32 %v2724_v23, %v2612_v20  ;;  %2916 = vmatprep.mubr.f32.mxu0 %v1293_v22 }
 0x1d4   : > { %v2613_v25 = vpop.f32.mrb[40].mxu0 }
 0x1d5   : > { %v2725_v26 = vpop.f32.mrb[40].mxu1  ;;  %2917 = vmatmul.mubr.f32.gmra.mrb[82].mxu0 %v1296_v24  ;;  %v2614_v27 = vpop.f32.mrb[41].mxu0 }
 0x1d6   : > { %v2615_v28 = vadd.f32 %v2614_v27, %v2613_v25  ;;  %v2726_v29 = vpop.f32.mrb[41].mxu1  ;;  %v2616_v30 = vpop.f32.mrb[42].mxu0 }
 0x1d7   : > { %v2727_v31 = vadd.f32 %v2726_v29, %v2725_v26  ;;  %v2728_v32 = vpop.f32.mrb[42].mxu1  ;;  %v2617_v33 = vpop.f32.mrb[43].mxu0 }
 0x1d8   : > { %v2618_v34 = vadd.f32 %v2617_v33, %v2616_v30  ;;  %v2729_v35 = vpop.f32.mrb[43].mxu1 }
 0x1d9   : > { %v1301_v36 = vadd.f32 %v2727_v31, %v2615_v28  ;;  %v2730_v37 = vadd.f32 %v2729_v35, %v2728_v32 }
 0x1db   : > { %v1304_v38 = vadd.f32 %v2730_v37, %v2618_v34  ;;  %2919 = vmatprep.mubr.f32.mxu0 %v1301_v36 }
 0x1dc   : > { %v2619_v39 = vpop.f32.mrb[44].mxu0 }
 0x1dd   : > { %v2731_v40 = vpop.f32.mrb[44].mxu1  ;;  %2920 = vmatmul.mubr.f32.gmra.mrb[84].mxu0 %v1304_v38  ;;  %v2620_v41 = vpop.f32.mrb[45].mxu0 }
 0x1de   : > { %v2621_v42 = vadd.f32 %v2620_v41, %v2619_v39  ;;  %v2732_v43 = vpop.f32.mrb[45].mxu1  ;;  %v2622_v44 = vpop.f32.mrb[46].mxu0 }
 0x1df   : > { %v2733_v45 = vadd.f32 %v2732_v43, %v2731_v40  ;;  %v2734_v46 = vpop.f32.mrb[46].mxu1  ;;  %v2623_v47 = vpop.f32.mrb[47].mxu0 }
 0x1e0   : > { %v2624_v48 = vadd.f32 %v2623_v47, %v2622_v44  ;;  %v2735_v49 = vpop.f32.mrb[47].mxu1 }
 0x1e1   : > { %v1309_v52 = vadd.f32 %v2733_v45, %v2621_v42  ;;  %v2736_v53 = vadd.f32 %v2735_v49, %v2734_v46 }
 0x1e3   : > { %v1312_v55 = vadd.f32 %v2736_v53, %v2624_v48  ;;  %2922 = vmatprep.mubr.f32.mxu0 %v1309_v52  ;;  %v3854_v48 = vld [vmem:[%s3966_s3] ss:$0 sm:$0xff] }
 0x1e4   : > { %v2625_v56 = vpop.f32.mrb[48].mxu0 }
 0x1e5   : > { %v2737_v57 = vpop.f32.mrb[48].mxu1  ;;  %2923 = vmatmul.mubr.f32.gmra.mrb[86].mxu0 %v1312_v55  ;;  %v2626_v58 = vpop.f32.mrb[49].mxu0 }
 0x1e6   : > { %v2627_v59 = vadd.f32 %v2626_v58, %v2625_v56  ;;  %v2738_v60 = vpop.f32.mrb[49].mxu1  ;;  %v2628_v61 = vpop.f32.mrb[50].mxu0 }
 0x1e7   : > { %v2739_v62 = vadd.f32 %v2738_v60, %v2737_v57  ;;  %v2740_v63 = vpop.f32.mrb[50].mxu1  ;;  %v2629_v0 = vpop.f32.mrb[51].mxu0 }
 0x1e8   : > { %v2630_v1 = vadd.f32 %v2629_v0, %v2628_v61  ;;  %v2741_v2 = vpop.f32.mrb[51].mxu1 }
 0x1e9   : > { %v1317_v3 = vadd.f32 %v2739_v62, %v2627_v59  ;;  %v2742_v4 = vadd.f32 %v2741_v2, %v2740_v63 }
 0x1eb   : > { %v1320_v5 = vadd.f32 %v2742_v4, %v2630_v1  ;;  %2925 = vmatprep.mubr.f32.mxu0 %v1317_v3 }
 0x1ec   : > { %v2631_v6 = vpop.f32.mrb[52].mxu0 }
 0x1ed   : > { %v2743_v7 = vpop.f32.mrb[52].mxu1  ;;  %2926 = vmatmul.mubr.f32.gmra.mrb[88].mxu0 %v1320_v5  ;;  %v2632_v8 = vpop.f32.mrb[53].mxu0 }
 0x1ee   : > { %v2633_v9 = vadd.f32 %v2632_v8, %v2631_v6  ;;  %v2744_v10 = vpop.f32.mrb[53].mxu1  ;;  %v2634_v11 = vpop.f32.mrb[54].mxu0 }
 0x1ef   : > { %v2745_v12 = vadd.f32 %v2744_v10, %v2743_v7  ;;  %v2746_v13 = vpop.f32.mrb[54].mxu1  ;;  %v2635_v14 = vpop.f32.mrb[55].mxu0 }
 0x1f0   : > { %v2636_v15 = vadd.f32 %v2635_v14, %v2634_v11  ;;  %v2747_v16 = vpop.f32.mrb[55].mxu1 }
 0x1f1   : > { %v1325_v17 = vadd.f32 %v2745_v12, %v2633_v9  ;;  %v2748_v18 = vadd.f32 %v2747_v16, %v2746_v13 }
 0x1f3   : > { %v1328_v19 = vadd.f32 %v2748_v18, %v2636_v15  ;;  %2928 = vmatprep.mubr.f32.mxu0 %v1325_v17 }
 0x1f4   : > { %v2637_v20 = vpop.f32.mrb[56].mxu0 }
 0x1f5   : > { %v2749_v21 = vpop.f32.mrb[56].mxu1  ;;  %2929 = vmatmul.mubr.f32.gmra.mrb[90].mxu0 %v1328_v19  ;;  %v2638_v22 = vpop.f32.mrb[57].mxu0 }
 0x1f6   : > { %v2639_v23 = vadd.f32 %v2638_v22, %v2637_v20  ;;  %v2750_v24 = vpop.f32.mrb[57].mxu1  ;;  %v2640_v25 = vpop.f32.mrb[58].mxu0 }
 0x1f7   : > { %v2751_v26 = vadd.f32 %v2750_v24, %v2749_v21  ;;  %v2752_v27 = vpop.f32.mrb[58].mxu1  ;;  %v2641_v28 = vpop.f32.mrb[59].mxu0 }
 0x1f8   : > { %v2642_v29 = vadd.f32 %v2641_v28, %v2640_v25  ;;  %v2753_v30 = vpop.f32.mrb[59].mxu1 }
 0x1f9   : > { %v1333_v31 = vadd.f32 %v2751_v26, %v2639_v23  ;;  %v2754_v32 = vadd.f32 %v2753_v30, %v2752_v27 }
 0x1fb   : > { %v1336_v33 = vadd.f32 %v2754_v32, %v2642_v29  ;;  %2931 = vmatprep.mubr.f32.mxu0 %v1333_v31 }
 0x1fc   : > { %v2643_v34 = vpop.f32.mrb[60].mxu0 }
 0x1fd   : > { %v2755_v35 = vpop.f32.mrb[60].mxu1  ;;  %2932 = vmatmul.mubr.f32.gmra.mrb[92].mxu0 %v1336_v33  ;;  %v2644_v36 = vpop.f32.mrb[61].mxu0 }
 0x1fe   : > { %v2645_v37 = vadd.f32 %v2644_v36, %v2643_v34  ;;  %v2756_v38 = vpop.f32.mrb[61].mxu1  ;;  %v2646_v39 = vpop.f32.mrb[62].mxu0 }
 0x1ff   : > { %v2757_v40 = vadd.f32 %v2756_v38, %v2755_v35  ;;  %v2758_v41 = vpop.f32.mrb[62].mxu1  ;;  %v2647_v42 = vpop.f32.mrb[63].mxu0 }
 0x200   : > { %v2648_v43 = vadd.f32 %v2647_v42, %v2646_v39  ;;  %v2759_v44 = vpop.f32.mrb[63].mxu1 }
 0x201   : > { %v1341_v45 = vadd.f32 %v2757_v40, %v2645_v37  ;;  %v2760_v46 = vadd.f32 %v2759_v44, %v2758_v41 }
 0x203   : > { %v1344_v47 = vadd.f32 %v2760_v46, %v2648_v43  ;;  %2934 = vmatprep.mubr.f32.mxu0 %v1341_v45 }
 0x205   : > { %2935 = vmatmul.mubr.f32.gmra.mrb[94].mxu0 %v1344_v47 }
 0x260   : > { %v2891_v49 = vpop.f32.mrb[64].mxu0 }
 0x261   : > { %v1541_v50 = vadd.f32 %v2891_v49, %v3854_v48  ;;  %v1535_v51 = vpop.f32.mrb[65].mxu0 }
 0x262   : > { %v1536_v52 = vadd.f32 %v3854_v48, %v1535_v51 }
 0x263   : > { %v1695_v54 = vmax.f32 %v1541_v50, 0.0 }
 0x264   : > { %v1694_v53 = vmax.f32 %v1536_v52, 0.0 }
 0x266   : > { %2969 = vmatprep.mubr.f32.mxu1 %v1694_v53 }
 0x267   : > { %2970 = vmatmul.mubr.f32.vlgmr.msra.gmra.mrb[64].mxu1 %v1695_v54 }
 0x268   : > { %v2894_v55 = vpop.f32.mrb[66].mxu0 }
 0x269   : > { %v1551_v56 = vadd.f32 %v2894_v55, %v3854_v48  ;;  %v1545_v57 = vpop.f32.mrb[67].mxu0 }
 0x26a   : > { %v1546_v58 = vadd.f32 %v3854_v48, %v1545_v57 }
 0x26b   : > { %v1697_v60 = vmax.f32 %v1551_v56, 0.0 }
 0x26c   : > { %v1696_v59 = vmax.f32 %v1546_v58, 0.0 }
 0x26e   : > { %2972 = vmatprep.mubr.f32.mxu1 %v1696_v59 }
 0x26f   : > { %2973 = vmatmul.mubr.f32.gmra.mrb[66].mxu1 %v1697_v60 }
 0x270   : > { %v2897_v61 = vpop.f32.mrb[68].mxu0 }
 0x271   : > { %v1561_v62 = vadd.f32 %v2897_v61, %v3854_v48  ;;  %v1555_v63 = vpop.f32.mrb[69].mxu0 }
 0x272   : > { %v1556_v0 = vadd.f32 %v3854_v48, %v1555_v63 }
 0x273   : > { %v1699_v2 = vmax.f32 %v1561_v62, 0.0 }
 0x274   : > { %v1698_v1 = vmax.f32 %v1556_v0, 0.0 }
 0x276   : > { %2975 = vmatprep.mubr.f32.mxu1 %v1698_v1 }
 0x277   : > { %2976 = vmatmul.mubr.f32.gmra.mrb[68].mxu1 %v1699_v2 }
 0x278   : > { %v2900_v3 = vpop.f32.mrb[70].mxu0 }
 0x279   : > { %v1571_v4 = vadd.f32 %v2900_v3, %v3854_v48  ;;  %v1565_v5 = vpop.f32.mrb[71].mxu0 }
 0x27a   : > { %v1566_v6 = vadd.f32 %v3854_v48, %v1565_v5 }
 0x27b   : > { %v1701_v8 = vmax.f32 %v1571_v4, 0.0 }
 0x27c   : > { %v1700_v7 = vmax.f32 %v1566_v6, 0.0 }
 0x27e   : > { %2978 = vmatprep.mubr.f32.mxu1 %v1700_v7 }
 0x27f   : > { %2979 = vmatmul.mubr.f32.gmra.mrb[70].mxu1 %v1701_v8 }
 0x280   : > { %v2903_v9 = vpop.f32.mrb[72].mxu0 }
 0x281   : > { %v1581_v10 = vadd.f32 %v2903_v9, %v3854_v48  ;;  %v1575_v11 = vpop.f32.mrb[73].mxu0 }
 0x282   : > { %v1576_v12 = vadd.f32 %v3854_v48, %v1575_v11 }
 0x283   : > { %v1703_v14 = vmax.f32 %v1581_v10, 0.0 }
 0x284   : > { %v1702_v13 = vmax.f32 %v1576_v12, 0.0 }
 0x286   : > { %2981 = vmatprep.mubr.f32.mxu1 %v1702_v13 }
 0x287   : > { %2982 = vmatmul.mubr.f32.gmra.mrb[72].mxu1 %v1703_v14 }
 0x288   : > { %v2906_v15 = vpop.f32.mrb[74].mxu0 }
 0x289   : > { %v1591_v16 = vadd.f32 %v2906_v15, %v3854_v48  ;;  %v1585_v17 = vpop.f32.mrb[75].mxu0 }
 0x28a   : > { %v1586_v18 = vadd.f32 %v3854_v48, %v1585_v17 }
 0x28b   : > { %v1705_v20 = vmax.f32 %v1591_v16, 0.0 }
 0x28c   : > { %v1704_v19 = vmax.f32 %v1586_v18, 0.0 }
 0x28e   : > { %2984 = vmatprep.mubr.f32.mxu1 %v1704_v19 }
 0x28f   : > { %2985 = vmatmul.mubr.f32.gmra.mrb[74].mxu1 %v1705_v20 }
 0x290   : > { %v2909_v21 = vpop.f32.mrb[76].mxu0 }
 0x291   : > { %v1601_v22 = vadd.f32 %v2909_v21, %v3854_v48  ;;  %v1595_v23 = vpop.f32.mrb[77].mxu0 }
 0x292   : > { %v1596_v24 = vadd.f32 %v3854_v48, %v1595_v23 }
 0x293   : > { %v1707_v26 = vmax.f32 %v1601_v22, 0.0 }
 0x294   : > { %v1706_v25 = vmax.f32 %v1596_v24, 0.0 }
 0x296   : > { %2987 = vmatprep.mubr.f32.mxu1 %v1706_v25 }
 0x297   : > { %2988 = vmatmul.mubr.f32.gmra.mrb[76].mxu1 %v1707_v26 }
 0x298   : > { %v2912_v27 = vpop.f32.mrb[78].mxu0 }
 0x299   : > { %v1611_v28 = vadd.f32 %v2912_v27, %v3854_v48  ;;  %v1605_v29 = vpop.f32.mrb[79].mxu0 }
 0x29a   : > { %v1606_v30 = vadd.f32 %v3854_v48, %v1605_v29 }
 0x29b   : > { %v1709_v32 = vmax.f32 %v1611_v28, 0.0 }
 0x29c   : > { %v1708_v31 = vmax.f32 %v1606_v30, 0.0 }
 0x29e   : > { %2990 = vmatprep.mubr.f32.mxu1 %v1708_v31 }
 0x29f   : > { %2991 = vmatmul.mubr.f32.gmra.mrb[78].mxu1 %v1709_v32 }
 0x2a0   : > { %v2915_v33 = vpop.f32.mrb[80].mxu0 }
 0x2a1   : > { %v1621_v34 = vadd.f32 %v2915_v33, %v3854_v48  ;;  %v1615_v35 = vpop.f32.mrb[81].mxu0 }
 0x2a2   : > { %v1616_v36 = vadd.f32 %v3854_v48, %v1615_v35 }
 0x2a3   : > { %v1711_v38 = vmax.f32 %v1621_v34, 0.0 }
 0x2a4   : > { %v1710_v37 = vmax.f32 %v1616_v36, 0.0 }
 0x2a6   : > { %2993 = vmatprep.mubr.f32.mxu1 %v1710_v37 }
 0x2a7   : > { %2994 = vmatmul.mubr.f32.gmra.mrb[80].mxu1 %v1711_v38 }
 0x2a8   : > { %v2918_v39 = vpop.f32.mrb[82].mxu0 }
 0x2a9   : > { %v1631_v40 = vadd.f32 %v2918_v39, %v3854_v48  ;;  %v1625_v41 = vpop.f32.mrb[83].mxu0 }
 0x2aa   : > { %v1626_v42 = vadd.f32 %v3854_v48, %v1625_v41 }
 0x2ab   : > { %v1713_v44 = vmax.f32 %v1631_v40, 0.0 }
 0x2ac   : > { %v1712_v43 = vmax.f32 %v1626_v42, 0.0 }
 0x2ae   : > { %2996 = vmatprep.mubr.f32.mxu1 %v1712_v43 }
 0x2af   : > { %2997 = vmatmul.mubr.f32.gmra.mrb[82].mxu1 %v1713_v44 }
 0x2b0   : > { %v2921_v45 = vpop.f32.mrb[84].mxu0 }
 0x2b1   : > { %v1641_v46 = vadd.f32 %v2921_v45, %v3854_v48  ;;  %v1635_v47 = vpop.f32.mrb[85].mxu0 }
 0x2b2   : > { %v1636_v49 = vadd.f32 %v3854_v48, %v1635_v47 }
 0x2b3   : > { %v1715_v51 = vmax.f32 %v1641_v46, 0.0 }
 0x2b4   : > { %v1714_v50 = vmax.f32 %v1636_v49, 0.0 }
 0x2b6   : > { %2999 = vmatprep.mubr.f32.mxu1 %v1714_v50 }
 0x2b7   : > { %3000 = vmatmul.mubr.f32.gmra.mrb[84].mxu1 %v1715_v51 }
 0x2b8   : > { %v2924_v52 = vpop.f32.mrb[86].mxu0 }
 0x2b9   : > { %v1651_v53 = vadd.f32 %v2924_v52, %v3854_v48  ;;  %v1645_v54 = vpop.f32.mrb[87].mxu0 }
 0x2ba   : > { %v1646_v55 = vadd.f32 %v3854_v48, %v1645_v54 }
 0x2bb   : > { %v1717_v57 = vmax.f32 %v1651_v53, 0.0 }
 0x2bc   : > { %v1716_v56 = vmax.f32 %v1646_v55, 0.0 }
 0x2be   : > { %3002 = vmatprep.mubr.f32.mxu1 %v1716_v56 }
 0x2bf   : > { %3003 = vmatmul.mubr.f32.gmra.mrb[86].mxu1 %v1717_v57 }
 0x2c0   : > { %v2927_v58 = vpop.f32.mrb[88].mxu0 }
 0x2c1   : > { %v1661_v59 = vadd.f32 %v2927_v58, %v3854_v48  ;;  %v1655_v60 = vpop.f32.mrb[89].mxu0 }
 0x2c2   : > { %v1656_v61 = vadd.f32 %v3854_v48, %v1655_v60 }
 0x2c3   : > { %v1719_v63 = vmax.f32 %v1661_v59, 0.0 }
 0x2c4   : > { %v1718_v62 = vmax.f32 %v1656_v61, 0.0 }
 0x2c6   : > { %3005 = vmatprep.mubr.f32.mxu1 %v1718_v62 }
 0x2c7   : > { %3006 = vmatmul.mubr.f32.gmra.mrb[88].mxu1 %v1719_v63 }
 0x2c8   : > { %v2930_v0 = vpop.f32.mrb[90].mxu0 }
 0x2c9   : > { %v1671_v1 = vadd.f32 %v2930_v0, %v3854_v48  ;;  %v1665_v2 = vpop.f32.mrb[91].mxu0 }
 0x2ca   : > { %v1666_v3 = vadd.f32 %v3854_v48, %v1665_v2 }
 0x2cb   : > { %v1721_v5 = vmax.f32 %v1671_v1, 0.0 }
 0x2cc   : > { %v1720_v4 = vmax.f32 %v1666_v3, 0.0 }
 0x2ce   : > { %3008 = vmatprep.mubr.f32.mxu1 %v1720_v4 }
 0x2cf   : > { %3009 = vmatmul.mubr.f32.gmra.mrb[90].mxu1 %v1721_v5 }
 0x2d0   : > { %v2933_v6 = vpop.f32.mrb[92].mxu0 }
 0x2d1   : > { %v1681_v7 = vadd.f32 %v2933_v6, %v3854_v48  ;;  %v1675_v8 = vpop.f32.mrb[93].mxu0 }
 0x2d2   : > { %v1676_v9 = vadd.f32 %v3854_v48, %v1675_v8 }
 0x2d3   : > { %v1723_v11 = vmax.f32 %v1681_v7, 0.0 }
 0x2d4   : > { %v1722_v10 = vmax.f32 %v1676_v9, 0.0 }
 0x2d6   : > { %3011 = vmatprep.mubr.f32.mxu1 %v1722_v10 }
 0x2d7   : > { %3012 = vmatmul.mubr.f32.gmra.mrb[92].mxu1 %v1723_v11 }
 0x2d8   : > { %v2936_v12 = vpop.f32.mrb[94].mxu0 }
 0x2d9   : > { %v1691_v13 = vadd.f32 %v2936_v12, %v3854_v48  ;;  %v1685_v14 = vpop.f32.mrb[95].mxu0 }
 0x2da   : > { %v1686_v15 = vadd.f32 %v3854_v48, %v1685_v14 }
 0x2db   : > { %v1725_v17 = vmax.f32 %v1691_v13, 0.0 }
 0x2dc   : > { %v1724_v16 = vmax.f32 %v1686_v15, 0.0 }
 0x2de   : > { %3014 = vmatprep.mubr.f32.mxu1 %v1724_v16 }
 0x2df   : > { %3015 = vmatmul.mubr.f32.gmra.mrb[94].mxu1 %v1725_v17 }
 0x33a   : > { %v2971_v18 = vpop.f32.mrb[64].mxu1 }
 0x33b   : > { %v1808_v19 = vpop.f32.mrb[65].mxu1 }
 0x33c   : > { %v2445_v20 = vpack.c.bf16 %v2971_v18, %v1808_v19 }
 0x33e   : > { %2446 = vst [vmem:[%s3889_s25] sm:$0xff] %v2445_v20  }
 0x342   : > { %v2974_v21 = vpop.f32.mrb[66].mxu1 }
 0x343   : > { %v1818_v22 = vpop.f32.mrb[67].mxu1 }
 0x344   : > { %v2450_v23 = vpack.c.bf16 %v2974_v21, %v1818_v22 }
 0x346   : > { %2522 = vst [vmem:[%s3889_s25 + $0x8] sm:$0xff] %v2450_v23  }
 0x34a   : > { %v2977_v48 = vpop.f32.mrb[68].mxu1 }
 0x34b   : > { %v1828_v24 = vpop.f32.mrb[69].mxu1 }
 0x34c   : > { %v2455_v25 = vpack.c.bf16 %v2977_v48, %v1828_v24 }
 0x34e   : > { %2523 = vst [vmem:[%s3889_s25 + $0x10] sm:$0xff] %v2455_v25  }
 0x352   : > { %v2980_v26 = vpop.f32.mrb[70].mxu1 }
 0x353   : > { %v1838_v27 = vpop.f32.mrb[71].mxu1 }
 0x354   : > { %v2460_v28 = vpack.c.bf16 %v2980_v26, %v1838_v27 }
 0x356   : > { %2524 = vst [vmem:[%s3889_s25 + $0x18] sm:$0xff] %v2460_v28  }
 0x35a   : > { %v2983_v29 = vpop.f32.mrb[72].mxu1 }
 0x35b   : > { %v1848_v30 = vpop.f32.mrb[73].mxu1 }
 0x35c   : > { %v2465_v31 = vpack.c.bf16 %v2983_v29, %v1848_v30 }
 0x35e   : > { %2525 = vst [vmem:[%s3889_s25 + $0x20] sm:$0xff] %v2465_v31  }
 0x362   : > { %v2986_v32 = vpop.f32.mrb[74].mxu1 }
 0x363   : > { %v1858_v33 = vpop.f32.mrb[75].mxu1 }
 0x364   : > { %v2470_v34 = vpack.c.bf16 %v2986_v32, %v1858_v33 }
 0x366   : > { %2526 = vst [vmem:[%s3889_s25 + $0x28] sm:$0xff] %v2470_v34  }
 0x36a   : > { %v2989_v35 = vpop.f32.mrb[76].mxu1 }
 0x36b   : > { %v1868_v36 = vpop.f32.mrb[77].mxu1 }
 0x36c   : > { %v2475_v37 = vpack.c.bf16 %v2989_v35, %v1868_v36 }
 0x36e   : > { %2527 = vst [vmem:[%s3889_s25 + $0x30] sm:$0xff] %v2475_v37  }
 0x372   : > { %v2992_v38 = vpop.f32.mrb[78].mxu1 }
 0x373   : > { %v1878_v39 = vpop.f32.mrb[79].mxu1 }
 0x374   : > { %v2480_v40 = vpack.c.bf16 %v2992_v38, %v1878_v39 }
 0x376   : > { %2528 = vst [vmem:[%s3889_s25 + $0x38] sm:$0xff] %v2480_v40  }
 0x37a   : > { %v2995_v41 = vpop.f32.mrb[80].mxu1 }
 0x37b   : > { %v1888_v42 = vpop.f32.mrb[81].mxu1 }
 0x37c   : > { %v2485_v43 = vpack.c.bf16 %v2995_v41, %v1888_v42 }
 0x37e   : > { %2529 = vst [vmem:[%s3889_s25 + $0x40] sm:$0xff] %v2485_v43  }
 0x382   : > { %v2998_v44 = vpop.f32.mrb[82].mxu1 }
 0x383   : > { %v1898_v45 = vpop.f32.mrb[83].mxu1 }
 0x384   : > { %v2490_v46 = vpack.c.bf16 %v2998_v44, %v1898_v45 }
 0x386   : > { %2530 = vst [vmem:[%s3889_s25 + $0x48] sm:$0xff] %v2490_v46  }
 0x38a   : > { %v3001_v47 = vpop.f32.mrb[84].mxu1 }
 0x38b   : > { %v1908_v49 = vpop.f32.mrb[85].mxu1 }
 0x38c   : > { %v2495_v50 = vpack.c.bf16 %v3001_v47, %v1908_v49 }
 0x38e   : > { %2531 = vst [vmem:[%s3889_s25 + $0x50] sm:$0xff] %v2495_v50  }
 0x392   : > { %v3004_v51 = vpop.f32.mrb[86].mxu1 }
 0x393   : > { %v1918_v52 = vpop.f32.mrb[87].mxu1 }
 0x394   : > { %v2500_v53 = vpack.c.bf16 %v3004_v51, %v1918_v52 }
 0x396   : > { %2532 = vst [vmem:[%s3889_s25 + $0x58] sm:$0xff] %v2500_v53  }
 0x39a   : > { %v3007_v54 = vpop.f32.mrb[88].mxu1 }
 0x39b   : > { %v1928_v55 = vpop.f32.mrb[89].mxu1 }
 0x39c   : > { %v2505_v56 = vpack.c.bf16 %v3007_v54, %v1928_v55 }
 0x39e   : > { %2533 = vst [vmem:[%s3889_s25 + $0x60] sm:$0xff] %v2505_v56  }
 0x3a2   : > { %v3010_v57 = vpop.f32.mrb[90].mxu1 }
 0x3a3   : > { %v1938_v58 = vpop.f32.mrb[91].mxu1 }
 0x3a4   : > { %v2510_v59 = vpack.c.bf16 %v3010_v57, %v1938_v58 }
 0x3a6   : > { %2534 = vst [vmem:[%s3889_s25 + $0x68] sm:$0xff] %v2510_v59  }
 0x3aa   : > { %v3013_v60 = vpop.f32.mrb[92].mxu1 }
 0x3ab   : > { %v1948_v61 = vpop.f32.mrb[93].mxu1 }
 0x3ac   : > { %v2515_v62 = vpack.c.bf16 %v3013_v60, %v1948_v61 }
 0x3ae   : > { %2535 = vst [vmem:[%s3889_s25 + $0x70] sm:$0xff] %v2515_v62  }
 0x3b2   : > { %v3016_v63 = vpop.f32.mrb[94].mxu1 }
 0x3b3   : > { %v1958_v0 = vpop.f32.mrb[95].mxu1 }
 0x3b4   : > { %v2520_v1 = vpack.c.bf16 %v3016_v63, %v1958_v0 }
 0x3b6   : > { %2536 = vst [vmem:[%s3889_s25 + $0x78] sm:$0xff] %v2520_v1  }
 0x3b7   : > { %3437 = shalt.err (!%p3434_p0)
}
 0x3b8   : > { %s3438_s8 = scalar_lea.hbm %s3911_s17, 2048  ;;  %s3442_s26 = scalar_lea.hbm %s3968_s5, 4096 }
 0x3b9   : > { %p3439_p4 = scmp.ne.s32.totalorder %s3911_s17, %s3438_s8  ;;  %p3443_p12 = scmp.lt.u32.totalorder %s3911_s17, %s3968_s5 }
 0x3ba   : > { %p3444_p1 = scmp.lt.u32.totalorder %s3442_s26, %s3438_s8  ;;  %p3446_p13 = scmp.lt.u32.totalorder %s3438_s8, %s3911_s17 }
 0x3bb   : > { %p3440_p8 = pnand %p3439_p4, %p3713_p3 }
 0x3bc   : > { %p3445_p7 = por %p3444_p1, %p3443_p12 }
 0x3bd   : > { %p3441_p2 = pneg %p3440_p8 }
 0x3be   : > { %p3447_p6 = por %p3446_p13, %p3445_p7 }
 0x3c0   : > { %p3448_p10 = pnand %p3447_p6, %p3441_p2 }
 0x3c2   : > { %3451 = shalt.err (!%p3448_p10)
}
 0x3c3   : > { %s3527_s25 = smov 64   ;;  %s3528_s7 = smov 4  }
 0x3c4   : > { %3095 = dma.vmem_to_hbm [thread:$0]  (%p3713_p3), %s3913_s10, 2048, %s3911_s17, %s2128_s24, %s3527_s25, %s3527_s25, %s3528_s7  }
 0x3c5 PF: > { %s3991_s9 = sld [smem:[#allocation16_spill]]  ;;  %s2156_s6 = sand.u32 1, %s3494_s18  }
 0x3c6   : > { %p3993_p5 = scmp.ge.s32.totalorder %s3514_s23, 2  ;;  %s2157_s27 = scalar_lea.sflag [#allocation5], %s2156_s6 }
 0x3cb   : > { %p3992_p11 = scmp.ne.s32.totalorder %s3991_s9, 0 }
 0x3cd   : > { %p3112_p9 = pnand %p3993_p5, %p3992_p11 }
 0x3cf   : > { %3489 = dma.done.wait (!%p3112_p9), %s2157_s27, 2048  }
 0x3d0   : > { %3491 = vsyncadd (!%p3112_p9), %s2157_s27, 4294965248  ;;  %s23_s23 = sadd.s32 1, %s3514_s23   ;;  %s3994_s18 = smov %s3498_s19 }
 0x3d1   : > { %p20_p0 = scmp.ge.s32.totalorder %s23_s23, 4   ;;  %s3995_s19 = smov %s3502_s20 }
 0x3d2   : > { %s3996_s20 = smov %s3722_s13  ;;  %s3997_s21 = smov %s3510_s22 }
 0x3d3   : > { %s3998_s22 = smov %s4000_s1  ;;  %22 = sbr.rel (!%p20_p0) target bundleno = 10 (0xa), region = 106 }
 0x3da   :  { %2162 = vsyncpa [#allocation4], 1 }
 0x3db   :  { %2164 = vsyncpa [#allocation4 + $0x1], 1 }
 0x3dc   :  { %2165 = vsyncpa [#allocation7], 1 }
 0x3dd   :  { %2166 = vsyncpa [#allocation10], 1 }
 0x3de   :  { %2167 = vsyncpa [#allocation5], 1 }
 0x3df   :  { %2169 = vsyncpa [#allocation5 + $0x1], 1 }

</bundles_post_ra>
